<compile_context>
chip_gen: v7x
topology: tpu7x:2x2x1
jax: 0.10.0
libtpu: 0.0.40
codegen_flags: <defaults>
</compile_context>

<pallas_src>
import jax
import jax.numpy as jnp
import numpy as np
from jax.experimental import pallas as pl
from jax.experimental.pallas import tpu as pltpu


def gau_kernel(xf_ref, zf_ref,
               wqg_t_ref, wsg_ref, bg_col_ref, bg_row_ref,
               wfi_e_t_ref, wfi_x_t_ref, bfi_ref,
               out_ref):
    """One (batch-tile, Nx-tile) block per grid step.

    xf_ref  : (bt, C, nt)    search features, channels-first, bf16
    zf_ref  : (bt, Nz, C)    template features, token-major, bf16 (tiny)
    out_ref : (bt, Cout, nt) channels-first output (lane dim = nt, dense)

    Weights are pre-folded (conv bias + BatchNorm), pre-stacked / pre-transposed on the
    host, stored in bfloat16; biases are f32.
    """
    f32 = jnp.float32
    bf16 = jnp.bfloat16

    bt, C, nt = xf_ref.shape
    Nz = zf_ref.shape[1]
    Cout = wfi_x_t_ref.shape[0]

    wqg_t = wqg_t_ref[...]        # (2C, C)   bf16: rows [0:C]=wq.T, [C:2C]=(wg*s).T
    wsg = wsg_ref[...]            # (C, 2C)   bf16: cols [0:C]=ws,   [C:2C]=wg*s
    wfi_e_t = wfi_e_t_ref[...]    # (Cout, C) bf16, BN folded
    wfi_x_t = wfi_x_t_ref[...]    # (Cout, C) bf16, BN folded

    # Bias broadcasts hoisted out of the batch loop (emitted once per grid step).
    bg_x = jnp.broadcast_to(bg_col_ref[...], (C, nt))       # (C, nt)   f32
    bg_z = jnp.broadcast_to(bg_row_ref[...], (Nz, C))       # (Nz, C)   f32
    bfi_x = jnp.broadcast_to(bfi_ref[...], (Cout, nt))      # (Cout, nt) f32

    for i in range(bt):                      # bt is capped small (<=2): short unroll
        xf_cn = xf_ref[i]                    # (C, nt)  bf16
        zf_nc = zf_ref[i]                    # (Nz, C)  bf16

        # --- template side: support + g conv fused into one stacked matmul ----------
        sz = jnp.dot(zf_nc, wsg, preferred_element_type=f32)            # (Nz, 2C)
        zf_t = sz[:, :C]                                                 # (Nz, C)
        zf_g = jnp.maximum(sz[:, C:] + bg_z, 0.0)                        # (Nz, C)

        # --- search side: query + g conv fused (M=2C=256 fills the MXU) -------------
        qx = jnp.dot(wqg_t, xf_cn, preferred_element_type=f32)          # (2C, nt)
        xf_t = qx[:C]                                                    # (C, nt)
        xf_g = jnp.maximum(qx[C:] + bg_x, 0.0)                           # (C, nt)

        # --- attention logits (Nz, nt); softmax over the template axis (axis 0) -----
        sim = jnp.dot(zf_t.astype(bf16), xf_t.astype(bf16),
                      preferred_element_type=f32)                        # (Nz, nt)
        sim = sim - jnp.max(sim, axis=0, keepdims=True)
        p = jnp.exp(sim)                                                 # f32
        p = p * pl.reciprocal(jnp.sum(p, axis=0, keepdims=True), approx=True)

        # --- reassociated fi_e branch: (Cout,C)·(Nz,C)^T -> tiny (Cout,Nz),
        #     then (Cout,Nz)·(Nz,nt) -- replaces the old large embedding matmul -------
        w_e = jax.lax.dot_general(wfi_e_t, zf_g.astype(bf16),
                                  (((1,), (1,)), ((), ())),
                                  preferred_element_type=f32)            # (Cout, Nz)
        pre = jnp.dot(w_e.astype(bf16), p.astype(bf16),
                      preferred_element_type=f32)                        # (Cout, nt)
        pre = pre + jnp.dot(wfi_x_t, xf_g.astype(bf16),
                            preferred_element_type=f32)
        out_ref[i] = jnp.maximum(pre + bfi_x, 0.0).astype(out_ref.dtype)


def fold_params(p):
    """Host-side: fold BatchNorm scale/bias + conv biases into the weights, stack the
    shared-RHS weights, transpose to the layouts the kernel expects, cast to bf16."""
    bf16 = jnp.bfloat16
    f32 = jnp.float32
    wg_f = p["wg"] * p["g_scale"]                     # (C, C): scale output channels
    bg_f = p["bg"] * p["g_scale"] + p["g_bias"]       # (1, C)
    wfi_e_f = p["wfi_e"] * p["fi_scale"]              # (C, Cout)
    wfi_x_f = p["wfi_x"] * p["fi_scale"]              # (C, Cout)
    bfi_f = p["bfi"] * p["fi_scale"] + p["fi_bias"]   # (1, Cout)
    return {
        "wqg_t": jnp.concatenate([p["wq"].T, wg_f.T], axis=0).astype(bf16),  # (2C, C)
        "wsg": jnp.concatenate([p["ws"], wg_f], axis=1).astype(bf16),        # (C, 2C)
        "bg_col": bg_f.T.astype(f32),          # (C, 1)   for channels-first xf path
        "bg_row": bg_f.astype(f32),            # (1, C)   for token-major zf path
        "wfi_e_t": wfi_e_f.T.astype(bf16),     # (Cout, C)
        "wfi_x_t": wfi_x_f.T.astype(bf16),     # (Cout, C)
        "bfi_col": bfi_f.T.astype(f32),        # (Cout, 1)
    }


def _pick_nx_tile(Nx, batch_grid_steps):
    """Lane-dense Nx tile: a multiple of 128 dividing Nx, as large as possible (<=512),
    while keeping >=2 total grid steps so both v7x TensorCores get work at B=1."""
    if Nx % 128 != 0:
        return Nx                      # full extent satisfies the BlockSpec constraint
    cands = [t for t in range(128, Nx + 1, 128) if Nx % t == 0]
    good = [t for t in cands if t <= 512 and (batch_grid_steps >= 2 or Nx // t >= 2)]
    if good:
        return max(good)
    return min(cands)


def graph_attention_union(zf, xf, params, *, batch_tile=None, nx_tile=None,
                          out_dtype=jnp.bfloat16):
    """zf, xf are NCHW (PyTorch convention). Returns NCHW output (bf16 by default)."""
    B, C, Hz, Wz = zf.shape
    _, _, Hx, Wx = xf.shape
    Nz, Nx = Hz * Wz, Hx * Wx

    fp = fold_params(params)
    Cout = fp["wfi_x_t"].shape[0]

    # NCHW -> (B, C, N): pure reshape (no HBM transpose of the big search tensor);
    # bf16 at the boundary halves the dominant HBM streams.
    xf_cn = xf.reshape(B, C, Nx).astype(jnp.bfloat16)
    # Template is tiny: one host transpose to token-major keeps every in-kernel matmul
    # a plain / trans_b dot and drops the second zf input stream entirely.
    zf_nc = jnp.transpose(zf.reshape(B, C, Nz), (0, 2, 1)).astype(jnp.bfloat16)

    # Batch tile: small (<=2) to bound live ranges in the static unroll; the grid
    # absorbs the rest.
    if batch_tile is None:
        batch_tile = 2
    bt = max(1, min(int(batch_tile), B, 4))
    while B % bt:
        bt -= 1

    # Nx tile: lane-dense, >=2 total grid steps when possible (v7x dual TensorCore).
    nt = int(nx_tile) if nx_tile is not None else _pick_nx_tile(Nx, B // bt)

    grid = (B // bt, Nx // nt)

    out_cn = pl.pallas_call(
        gau_kernel,
        out_shape=jax.ShapeDtypeStruct((B, Cout, Nx), out_dtype),
        grid=grid,
        in_specs=[
            pl.BlockSpec((bt, C, nt), lambda b, x: (b, 0, x)),   # xf (bf16)
            pl.BlockSpec((bt, Nz, C), lambda b, x: (b, 0, 0)),   # zf token-major (bf16)
            pl.BlockSpec((2 * C, C), lambda b, x: (0, 0)),       # wqg_t
            pl.BlockSpec((C, 2 * C), lambda b, x: (0, 0)),       # wsg
            pl.BlockSpec((C, 1), lambda b, x: (0, 0)),           # bg_col (folded)
            pl.BlockSpec((1, C), lambda b, x: (0, 0)),           # bg_row (folded)
            pl.BlockSpec((Cout, C), lambda b, x: (0, 0)),        # wfi_e_t (BN folded)
            pl.BlockSpec((Cout, C), lambda b, x: (0, 0)),        # wfi_x_t (BN folded)
            pl.BlockSpec((Cout, 1), lambda b, x: (0, 0)),        # bfi (folded)
        ],
        out_specs=pl.BlockSpec((bt, Cout, nt), lambda b, x: (b, 0, x)),
        compiler_params=pltpu.CompilerParams(
            dimension_semantics=("parallel", "parallel"),
            # Comfortably under v5e/v6e defaults and v7x's 64 MiB physical; per-step
            # blocks here total well under 1 MiB, so there is headroom to deepen
            # buffering (pl.Buffered) if DMA ever shows as exposed.
            vmem_limit_bytes=32 * 1024 * 1024,
        ),
    )(xf_cn, zf_nc,
      fp["wqg_t"], fp["wsg"], fp["bg_col"], fp["bg_row"],
      fp["wfi_e_t"], fp["wfi_x_t"], fp["bfi_col"])

    # (B, Cout, Nx) -> NCHW: pure reshape, no transpose.
    return out_cn.reshape(B, Cout, Hx, Wx)


def init_params(key, C, Cout):
    """Deterministic synthetic parameters (shapes match Graph_Attention_Union(C, Cout)).
    Conv weights are stored as (Cin, Cout) matrices; BatchNorm is folded assuming
    eval-mode running stats mean=0, var=1 (real checkpoints must fold their actual
    running statistics)."""
    ks = jax.random.split(key, 10)
    eps = 1e-5
    s = 0.25 / np.sqrt(C)
    s2 = 0.5 / np.sqrt(2 * C)
    wq = s * jax.random.normal(ks[0], (C, C), jnp.float32)
    ws = s * jax.random.normal(ks[1], (C, C), jnp.float32)
    wg = s * jax.random.normal(ks[2], (C, C), jnp.float32)
    bg = 0.1 * jax.random.normal(ks[3], (1, C), jnp.float32)
    g_gamma = 1.0 + 0.1 * jax.random.normal(ks[4], (1, C), jnp.float32)
    g_beta = 0.1 * jax.random.normal(ks[5], (1, C), jnp.float32)
    wfi = s2 * jax.random.normal(ks[6], (2 * C, Cout), jnp.float32)
    bfi = 0.1 * jax.random.normal(ks[7], (1, Cout), jnp.float32)
    fi_gamma = 1.0 + 0.1 * jax.random.normal(ks[8], (1, Cout), jnp.float32)
    fi_beta = 0.1 * jax.random.normal(ks[9], (1, Cout), jnp.float32)
    inv_std = 1.0 / np.sqrt(1.0 + eps)
    return {
        "wq": wq, "ws": ws, "wg": wg, "bg": bg,
        "g_scale": g_gamma * inv_std, "g_bias": g_beta,
        "wfi_e": wfi[:C], "wfi_x": wfi[C:], "bfi": bfi,
        "fi_scale": fi_gamma * inv_std, "fi_bias": fi_beta,
    }


def reference_jax(zf, xf, p):
    """Pure-JAX f32 reference of Graph_Attention_Union.forward (NCHW in/out)."""
    B, C, Hz, Wz = zf.shape
    _, _, Hx, Wx = xf.shape
    Nz, Nx = Hz * Wz, Hx * Wx
    zf_tok = zf.reshape(B, C, Nz).transpose(0, 2, 1)
    xf_tok = xf.reshape(B, C, Nx).transpose(0, 2, 1)
    xf_t = xf_tok @ p["wq"]
    zf_t = zf_tok @ p["ws"]
    xf_g = jax.nn.relu((xf_tok @ p["wg"] + p["bg"]) * p["g_scale"] + p["g_bias"])
    zf_g = jax.nn.relu((zf_tok @ p["wg"] + p["bg"]) * p["g_scale"] + p["g_bias"])
    sim = jax.nn.softmax(jnp.einsum("bxc,bzc->bxz", xf_t, zf_t), axis=-1)
    emb = jnp.einsum("bxz,bzc->bxc", sim, zf_g)
    pre = emb @ p["wfi_e"] + xf_g @ p["wfi_x"] + p["bfi"]
    out = jax.nn.relu(pre * p["fi_scale"] + p["fi_bias"])
    Cout = out.shape[-1]
    return out.transpose(0, 2, 1).reshape(B, Cout, Hx, Wx)


if __name__ == "__main__":
    key = jax.random.PRNGKey(0)
    k_z, k_x, k_p = jax.random.split(key, 3)

    # Small but lane-dense shapes: C/Cout multiples of 128, Nx a multiple of 128.
    B, C, Cout = 2, 128, 128
    Hz = Wz = 4      # template feature map  -> Nz = 16
    Hx = Wx = 16     # search feature map    -> Nx = 256

    zf = jax.random.normal(k_z, (B, C, Hz, Wz), jnp.float32)   # NCHW, like PyTorch
    xf = jax.random.normal(k_x, (B, C, Hx, Wx), jnp.float32)
    params = init_params(k_p, C, Cout)

    out = graph_attention_union(zf, xf, params)
    out = jax.block_until_ready(out)

    ref = reference_jax(zf, xf, params)
    assert out.shape == (B, Cout, Hx, Wx)
    # bf16 inputs/weights/output (f32 accumulation) + approx reciprocal -> loosened tol.
    np.testing.assert_allclose(np.asarray(out, dtype=np.float32), np.asarray(ref),
                               rtol=3e-2, atol=3e-2)

    print("KERNEL_OK")
</pallas_src>

<mosaic_0001>
module attributes {stable_mosaic.version = 11 : i64} {
  func.func @gau_kernel(%arg0: i32, %arg1: i32, %arg2: memref<2x128x128xbf16, #tpu.memory_space<vmem>>, %arg3: memref<2x16x128xbf16, #tpu.memory_space<vmem>>, %arg4: memref<256x128xbf16, #tpu.memory_space<vmem>>, %arg5: memref<128x256xbf16, #tpu.memory_space<vmem>>, %arg6: memref<128x1xf32, #tpu.memory_space<vmem>>, %arg7: memref<1x128xf32, #tpu.memory_space<vmem>>, %arg8: memref<128x128xbf16, #tpu.memory_space<vmem>>, %arg9: memref<128x128xbf16, #tpu.memory_space<vmem>>, %arg10: memref<128x1xf32, #tpu.memory_space<vmem>>, %arg11: memref<2x128x128xbf16, #tpu.memory_space<vmem>>) attributes {dimension_semantics = [#tpu.dimension_semantics<parallel>, #tpu.dimension_semantics<parallel>], iteration_bounds = array<i64: 1, 2>, scalar_prefetch = 0 : i64, scratch_operands = 0 : i64, tpu.core_type = #tpu.core_type<tc>, window_params = [{transform_indices = @transform_0, window_bounds = array<i64: 2, 128, 128>}, {transform_indices = @transform_1, window_bounds = array<i64: 2, 16, 128>}, {pipeline_mode = #tpu.pipeline_mode<synchronous>, transform_indices = @transform_2, window_bounds = array<i64: 256, 128>}, {pipeline_mode = #tpu.pipeline_mode<synchronous>, transform_indices = @transform_3, window_bounds = array<i64: 128, 256>}, {pipeline_mode = #tpu.pipeline_mode<synchronous>, transform_indices = @transform_4, window_bounds = array<i64: 128, 1>}, {pipeline_mode = #tpu.pipeline_mode<synchronous>, transform_indices = @transform_5, window_bounds = array<i64: 1, 128>}, {pipeline_mode = #tpu.pipeline_mode<synchronous>, transform_indices = @transform_6, window_bounds = array<i64: 128, 128>}, {pipeline_mode = #tpu.pipeline_mode<synchronous>, transform_indices = @transform_7, window_bounds = array<i64: 128, 128>}, {pipeline_mode = #tpu.pipeline_mode<synchronous>, transform_indices = @transform_8, window_bounds = array<i64: 128, 1>}, {transform_indices = @transform_9, window_bounds = array<i64: 2, 128, 128>}]} {
    %c0 = arith.constant 0 : index
    %c0_0 = arith.constant 0 : index
    %0 = vector.load %arg4[%c0, %c0_0] : memref<256x128xbf16, #tpu.memory_space<vmem>>, vector<256x128xbf16>
    %c0_1 = arith.constant 0 : index
    %c0_2 = arith.constant 0 : index
    %1 = vector.load %arg5[%c0_1, %c0_2] : memref<128x256xbf16, #tpu.memory_space<vmem>>, vector<128x256xbf16>
    %c0_3 = arith.constant 0 : index
    %c0_4 = arith.constant 0 : index
    %2 = vector.load %arg8[%c0_3, %c0_4] : memref<128x128xbf16, #tpu.memory_space<vmem>>, vector<128x128xbf16>
    %c0_5 = arith.constant 0 : index
    %c0_6 = arith.constant 0 : index
    %3 = vector.load %arg9[%c0_5, %c0_6] : memref<128x128xbf16, #tpu.memory_space<vmem>>, vector<128x128xbf16>
    %c0_7 = arith.constant 0 : index
    %c0_8 = arith.constant 0 : index
    %4 = vector.load %arg6[%c0_7, %c0_8] : memref<128x1xf32, #tpu.memory_space<vmem>>, vector<128x1xf32>
    %5 = vector.shape_cast %4 : vector<128x1xf32> to vector<128x1xf32>
    %6 = vector.broadcast %5 : vector<128x1xf32> to vector<128x128xf32>
    %c0_9 = arith.constant 0 : index
    %c0_10 = arith.constant 0 : index
    %7 = vector.load %arg7[%c0_9, %c0_10] : memref<1x128xf32, #tpu.memory_space<vmem>>, vector<1x128xf32>
    %8 = vector.shape_cast %7 : vector<1x128xf32> to vector<1x128xf32>
    %9 = vector.broadcast %8 : vector<1x128xf32> to vector<16x128xf32>
    %c0_11 = arith.constant 0 : index
    %c0_12 = arith.constant 0 : index
    %10 = vector.load %arg10[%c0_11, %c0_12] : memref<128x1xf32, #tpu.memory_space<vmem>>, vector<128x1xf32>
    %11 = vector.shape_cast %10 : vector<128x1xf32> to vector<128x1xf32>
    %12 = vector.broadcast %11 : vector<128x1xf32> to vector<128x128xf32>
    %c0_13 = arith.constant 0 : index
    %c0_14 = arith.constant 0 : index
    %c0_15 = arith.constant 0 : index
    %13 = vector.load %arg2[%c0_13, %c0_14, %c0_15] : memref<2x128x128xbf16, #tpu.memory_space<vmem>>, vector<1x128x128xbf16>
    %14 = vector.shape_cast %13 : vector<1x128x128xbf16> to vector<128x128xbf16>
    %c0_16 = arith.constant 0 : index
    %c0_17 = arith.constant 0 : index
    %c0_18 = arith.constant 0 : index
    %15 = vector.load %arg3[%c0_16, %c0_17, %c0_18] : memref<2x16x128xbf16, #tpu.memory_space<vmem>>, vector<1x16x128xbf16>
    %16 = vector.shape_cast %15 : vector<1x16x128xbf16> to vector<16x128xbf16>
    %cst = arith.constant dense<0.000000e+00> : vector<16x256xf32>
    %17 = tpu.matmul %16, %1, %cst {dimension_numbers = #tpu.dot_dimension_numbers<[1], [0], [0], [1], [0, 0, 1, 1], [], []>} : vector<16x128xbf16>, vector<128x256xbf16>, vector<16x256xf32> -> vector<16x256xf32>
    %18 = vector.extract_strided_slice %17 {offsets = [0, 0], sizes = [16, 128], strides = [1, 1]} : vector<16x256xf32> to vector<16x128xf32>
    %19 = vector.extract_strided_slice %17 {offsets = [0, 128], sizes = [16, 128], strides = [1, 1]} : vector<16x256xf32> to vector<16x128xf32>
    %20 = arith.addf %19, %9 : vector<16x128xf32>
    %cst_19 = arith.constant 0.000000e+00 : f32
    %21 = vector.broadcast %cst_19 : f32 to vector<16x128xf32>
    %22 = arith.maximumf %20, %21 : vector<16x128xf32>
    %cst_20 = arith.constant dense<0.000000e+00> : vector<256x128xf32>
    %23 = tpu.matmul %0, %14, %cst_20 {dimension_numbers = #tpu.dot_dimension_numbers<[1], [0], [0], [1], [0, 0, 1, 1], [], []>} : vector<256x128xbf16>, vector<128x128xbf16>, vector<256x128xf32> -> vector<256x128xf32>
    %24 = vector.extract_strided_slice %23 {offsets = [0, 0], sizes = [128, 128], strides = [1, 1]} : vector<256x128xf32> to vector<128x128xf32>
    %25 = vector.extract_strided_slice %23 {offsets = [128, 0], sizes = [128, 128], strides = [1, 1]} : vector<256x128xf32> to vector<128x128xf32>
    %26 = arith.addf %25, %6 : vector<128x128xf32>
    %cst_21 = arith.constant 0.000000e+00 : f32
    %27 = vector.broadcast %cst_21 : f32 to vector<128x128xf32>
    %28 = arith.maximumf %26, %27 : vector<128x128xf32>
    %29 = arith.truncf %18 : vector<16x128xf32> to vector<16x128xbf16>
    %30 = arith.truncf %24 : vector<128x128xf32> to vector<128x128xbf16>
    %cst_22 = arith.constant dense<0.000000e+00> : vector<16x128xf32>
    %31 = tpu.matmul %29, %30, %cst_22 {dimension_numbers = #tpu.dot_dimension_numbers<[1], [0], [0], [1], [0, 0, 1, 1], [], []>} : vector<16x128xbf16>, vector<128x128xbf16>, vector<16x128xf32> -> vector<16x128xf32>
    %cst_23 = arith.constant dense<0xFF800000> : vector<128xf32>
    %32 = vector.multi_reduction <maximumf>, %31, %cst_23 [0] : vector<16x128xf32> to vector<128xf32>
    %33 = vector.shape_cast %32 : vector<128xf32> to vector<1x128xf32>
    %34 = vector.broadcast %33 : vector<1x128xf32> to vector<16x128xf32>
    %35 = arith.subf %31, %34 : vector<16x128xf32>
    %36 = math.exp %35 : vector<16x128xf32>
    %cst_24 = arith.constant dense<0.000000e+00> : vector<128xf32>
    %37 = vector.multi_reduction <add>, %36, %cst_24 [0] : vector<16x128xf32> to vector<128xf32>
    %38 = vector.shape_cast %37 : vector<128xf32> to vector<1x128xf32>
    %39 = tpu.reciprocal %38 {approx = true} : vector<1x128xf32> -> vector<1x128xf32>
    %40 = vector.broadcast %39 : vector<1x128xf32> to vector<16x128xf32>
    %41 = arith.mulf %36, %40 : vector<16x128xf32>
    %42 = arith.truncf %22 : vector<16x128xf32> to vector<16x128xbf16>
    %cst_25 = arith.constant dense<0.000000e+00> : vector<128x16xf32>
    %43 = tpu.matmul %2, %42, %cst_25 {dimension_numbers = #tpu.dot_dimension_numbers<[1], [1], [0], [0], [0, 0, 1, 0], [], []>} : vector<128x128xbf16>, vector<16x128xbf16>, vector<128x16xf32> -> vector<128x16xf32>
    %44 = arith.truncf %43 : vector<128x16xf32> to vector<128x16xbf16>
    %45 = arith.truncf %41 : vector<16x128xf32> to vector<16x128xbf16>
    %cst_26 = arith.constant dense<0.000000e+00> : vector<128x128xf32>
    %46 = tpu.matmul %44, %45, %cst_26 {dimension_numbers = #tpu.dot_dimension_numbers<[1], [0], [0], [1], [0, 0, 1, 1], [], []>} : vector<128x16xbf16>, vector<16x128xbf16>, vector<128x128xf32> -> vector<128x128xf32>
    %47 = arith.truncf %28 : vector<128x128xf32> to vector<128x128xbf16>
    %cst_27 = arith.constant dense<0.000000e+00> : vector<128x128xf32>
    %48 = tpu.matmul %3, %47, %cst_27 {dimension_numbers = #tpu.dot_dimension_numbers<[1], [0], [0], [1], [0, 0, 1, 1], [], []>} : vector<128x128xbf16>, vector<128x128xbf16>, vector<128x128xf32> -> vector<128x128xf32>
    %49 = arith.addf %46, %48 : vector<128x128xf32>
    %50 = arith.addf %49, %12 : vector<128x128xf32>
    %cst_28 = arith.constant 0.000000e+00 : f32
    %51 = vector.broadcast %cst_28 : f32 to vector<128x128xf32>
    %52 = arith.maximumf %50, %51 : vector<128x128xf32>
    %53 = arith.truncf %52 : vector<128x128xf32> to vector<128x128xbf16>
    %c0_29 = arith.constant 0 : index
    %c0_30 = arith.constant 0 : index
    %c0_31 = arith.constant 0 : index
    %54 = vector.load %arg11[%c0_29, %c0_30, %c0_31] : memref<2x128x128xbf16, #tpu.memory_space<vmem>>, vector<1x128x128xbf16>
    %55 = vector.shape_cast %54 : vector<1x128x128xbf16> to vector<128x128xbf16>
    %56 = vector.shape_cast %53 : vector<128x128xbf16> to vector<1x128x128xbf16>
    tpu.vector_store %arg11[%c0_29, %c0_30, %c0_31], %56 {strides = array<i32>} : memref<2x128x128xbf16, #tpu.memory_space<vmem>>, vector<1x128x128xbf16>,
    %c1 = arith.constant 1 : index
    %c0_32 = arith.constant 0 : index
    %c0_33 = arith.constant 0 : index
    %57 = vector.load %arg2[%c1, %c0_32, %c0_33] : memref<2x128x128xbf16, #tpu.memory_space<vmem>>, vector<1x128x128xbf16>
    %58 = vector.shape_cast %57 : vector<1x128x128xbf16> to vector<128x128xbf16>
    %c1_34 = arith.constant 1 : index
    %c0_35 = arith.constant 0 : index
    %c0_36 = arith.constant 0 : index
    %59 = vector.load %arg3[%c1_34, %c0_35, %c0_36] : memref<2x16x128xbf16, #tpu.memory_space<vmem>>, vector<1x16x128xbf16>
    %60 = vector.shape_cast %59 : vector<1x16x128xbf16> to vector<16x128xbf16>
    %cst_37 = arith.constant dense<0.000000e+00> : vector<16x256xf32>
    %61 = tpu.matmul %60, %1, %cst_37 {dimension_numbers = #tpu.dot_dimension_numbers<[1], [0], [0], [1], [0, 0, 1, 1], [], []>} : vector<16x128xbf16>, vector<128x256xbf16>, vector<16x256xf32> -> vector<16x256xf32>
    %62 = vector.extract_strided_slice %61 {offsets = [0, 0], sizes = [16, 128], strides = [1, 1]} : vector<16x256xf32> to vector<16x128xf32>
    %63 = vector.extract_strided_slice %61 {offsets = [0, 128], sizes = [16, 128], strides = [1, 1]} : vector<16x256xf32> to vector<16x128xf32>
    %64 = arith.addf %63, %9 : vector<16x128xf32>
    %cst_38 = arith.constant 0.000000e+00 : f32
    %65 = vector.broadcast %cst_38 : f32 to vector<16x128xf32>
    %66 = arith.maximumf %64, %65 : vector<16x128xf32>
    %cst_39 = arith.constant dense<0.000000e+00> : vector<256x128xf32>
    %67 = tpu.matmul %0, %58, %cst_39 {dimension_numbers = #tpu.dot_dimension_numbers<[1], [0], [0], [1], [0, 0, 1, 1], [], []>} : vector<256x128xbf16>, vector<128x128xbf16>, vector<256x128xf32> -> vector<256x128xf32>
    %68 = vector.extract_strided_slice %67 {offsets = [0, 0], sizes = [128, 128], strides = [1, 1]} : vector<256x128xf32> to vector<128x128xf32>
    %69 = vector.extract_strided_slice %67 {offsets = [128, 0], sizes = [128, 128], strides = [1, 1]} : vector<256x128xf32> to vector<128x128xf32>
    %70 = arith.addf %69, %6 : vector<128x128xf32>
    %cst_40 = arith.constant 0.000000e+00 : f32
    %71 = vector.broadcast %cst_40 : f32 to vector<128x128xf32>
    %72 = arith.maximumf %70, %71 : vector<128x128xf32>
    %73 = arith.truncf %62 : vector<16x128xf32> to vector<16x128xbf16>
    %74 = arith.truncf %68 : vector<128x128xf32> to vector<128x128xbf16>
    %cst_41 = arith.constant dense<0.000000e+00> : vector<16x128xf32>
    %75 = tpu.matmul %73, %74, %cst_41 {dimension_numbers = #tpu.dot_dimension_numbers<[1], [0], [0], [1], [0, 0, 1, 1], [], []>} : vector<16x128xbf16>, vector<128x128xbf16>, vector<16x128xf32> -> vector<16x128xf32>
    %cst_42 = arith.constant dense<0xFF800000> : vector<128xf32>
    %76 = vector.multi_reduction <maximumf>, %75, %cst_42 [0] : vector<16x128xf32> to vector<128xf32>
    %77 = vector.shape_cast %76 : vector<128xf32> to vector<1x128xf32>
    %78 = vector.broadcast %77 : vector<1x128xf32> to vector<16x128xf32>
    %79 = arith.subf %75, %78 : vector<16x128xf32>
    %80 = math.exp %79 : vector<16x128xf32>
    %cst_43 = arith.constant dense<0.000000e+00> : vector<128xf32>
    %81 = vector.multi_reduction <add>, %80, %cst_43 [0] : vector<16x128xf32> to vector<128xf32>
    %82 = vector.shape_cast %81 : vector<128xf32> to vector<1x128xf32>
    %83 = tpu.reciprocal %82 {approx = true} : vector<1x128xf32> -> vector<1x128xf32>
    %84 = vector.broadcast %83 : vector<1x128xf32> to vector<16x128xf32>
    %85 = arith.mulf %80, %84 : vector<16x128xf32>
    %86 = arith.truncf %66 : vector<16x128xf32> to vector<16x128xbf16>
    %cst_44 = arith.constant dense<0.000000e+00> : vector<128x16xf32>
    %87 = tpu.matmul %2, %86, %cst_44 {dimension_numbers = #tpu.dot_dimension_numbers<[1], [1], [0], [0], [0, 0, 1, 0], [], []>} : vector<128x128xbf16>, vector<16x128xbf16>, vector<128x16xf32> -> vector<128x16xf32>
    %88 = arith.truncf %87 : vector<128x16xf32> to vector<128x16xbf16>
    %89 = arith.truncf %85 : vector<16x128xf32> to vector<16x128xbf16>
    %cst_45 = arith.constant dense<0.000000e+00> : vector<128x128xf32>
    %90 = tpu.matmul %88, %89, %cst_45 {dimension_numbers = #tpu.dot_dimension_numbers<[1], [0], [0], [1], [0, 0, 1, 1], [], []>} : vector<128x16xbf16>, vector<16x128xbf16>, vector<128x128xf32> -> vector<128x128xf32>
    %91 = arith.truncf %72 : vector<128x128xf32> to vector<128x128xbf16>
    %cst_46 = arith.constant dense<0.000000e+00> : vector<128x128xf32>
    %92 = tpu.matmul %3, %91, %cst_46 {dimension_numbers = #tpu.dot_dimension_numbers<[1], [0], [0], [1], [0, 0, 1, 1], [], []>} : vector<128x128xbf16>, vector<128x128xbf16>, vector<128x128xf32> -> vector<128x128xf32>
    %93 = arith.addf %90, %92 : vector<128x128xf32>
    %94 = arith.addf %93, %12 : vector<128x128xf32>
    %cst_47 = arith.constant 0.000000e+00 : f32
    %95 = vector.broadcast %cst_47 : f32 to vector<128x128xf32>
    %96 = arith.maximumf %94, %95 : vector<128x128xf32>
    %97 = arith.truncf %96 : vector<128x128xf32> to vector<128x128xbf16>
    %c1_48 = arith.constant 1 : index
    %c0_49 = arith.constant 0 : index
    %c0_50 = arith.constant 0 : index
    %98 = vector.load %arg11[%c1_48, %c0_49, %c0_50] : memref<2x128x128xbf16, #tpu.memory_space<vmem>>, vector<1x128x128xbf16>
    %99 = vector.shape_cast %98 : vector<1x128x128xbf16> to vector<128x128xbf16>
    %100 = vector.shape_cast %97 : vector<128x128xbf16> to vector<1x128x128xbf16>
    tpu.vector_store %arg11[%c1_48, %c0_49, %c0_50], %100 {strides = array<i32>} : memref<2x128x128xbf16, #tpu.memory_space<vmem>>, vector<1x128x128xbf16>,
    return
  }
  func.func @transform_0(%arg0: i32, %arg1: i32) -> (i32, i32, i32) {
    %c0_i32 = arith.constant 0 : i32
    %c0_i32_0 = arith.constant 0 : i32
    return %arg0, %c0_i32, %arg1 : i32, i32, i32
  }
  func.func @transform_1(%arg0: i32, %arg1: i32) -> (i32, i32, i32) {
    %c0_i32 = arith.constant 0 : i32
    %c0_i32_0 = arith.constant 0 : i32
    %c0_i32_1 = arith.constant 0 : i32
    return %arg0, %c0_i32, %c0_i32_0 : i32, i32, i32
  }
  func.func @transform_2(%arg0: i32, %arg1: i32) -> (i32, i32) {
    %c0_i32 = arith.constant 0 : i32
    %c0_i32_0 = arith.constant 0 : i32
    %c0_i32_1 = arith.constant 0 : i32
    return %c0_i32, %c0_i32_0 : i32, i32
  }
  func.func @transform_3(%arg0: i32, %arg1: i32) -> (i32, i32) {
    %c0_i32 = arith.constant 0 : i32
    %c0_i32_0 = arith.constant 0 : i32
    %c0_i32_1 = arith.constant 0 : i32
    return %c0_i32, %c0_i32_0 : i32, i32
  }
  func.func @transform_4(%arg0: i32, %arg1: i32) -> (i32, i32) {
    %c0_i32 = arith.constant 0 : i32
    %c0_i32_0 = arith.constant 0 : i32
    %c0_i32_1 = arith.constant 0 : i32
    return %c0_i32, %c0_i32_0 : i32, i32
  }
  func.func @transform_5(%arg0: i32, %arg1: i32) -> (i32, i32) {
    %c0_i32 = arith.constant 0 : i32
    %c0_i32_0 = arith.constant 0 : i32
    %c0_i32_1 = arith.constant 0 : i32
    return %c0_i32, %c0_i32_0 : i32, i32
  }
  func.func @transform_6(%arg0: i32, %arg1: i32) -> (i32, i32) {
    %c0_i32 = arith.constant 0 : i32
    %c0_i32_0 = arith.constant 0 : i32
    %c0_i32_1 = arith.constant 0 : i32
    return %c0_i32, %c0_i32_0 : i32, i32
  }
  func.func @transform_7(%arg0: i32, %arg1: i32) -> (i32, i32) {
    %c0_i32 = arith.constant 0 : i32
    %c0_i32_0 = arith.constant 0 : i32
    %c0_i32_1 = arith.constant 0 : i32
    return %c0_i32, %c0_i32_0 : i32, i32
  }
  func.func @transform_8(%arg0: i32, %arg1: i32) -> (i32, i32) {
    %c0_i32 = arith.constant 0 : i32
    %c0_i32_0 = arith.constant 0 : i32
    %c0_i32_1 = arith.constant 0 : i32
    return %c0_i32, %c0_i32_0 : i32, i32
  }
  func.func @transform_9(%arg0: i32, %arg1: i32) -> (i32, i32, i32) {
    %c0_i32 = arith.constant 0 : i32
    %c0_i32_0 = arith.constant 0 : i32
    return %arg0, %c0_i32, %arg1 : i32, i32, i32
  }
}

</mosaic_0001>

<bundles_post_ra>
// kernel: tpu_custom_call.1
= control target key start
LH: loop header
LB: loop body
LE: loop exit
PB: predicated region body
PF: predicated region fallthrough
CT: control target
= control target key end

     0   :  { %s5069_s0 = inlined_call_operand.vmem [shape: bf16[2,128,256], index: 0, kind: input, shape index: {}]   ;;  %s5070_s1 = inlined_call_operand.hbm [shape: bf16[2,16,128], index: 1, kind: input, shape index: {}]   ;;  %s5071_s2 = inlined_call_operand.hbm [shape: bf16[256,128], index: 2, kind: input, shape index: {}]   ;;  %s5072_s3 = inlined_call_operand.hbm [shape: bf16[128,256], index: 3, kind: input, shape index: {}]   ;;  %s5073_s4 = inlined_call_operand.vmem [shape: f32[128,1], index: 4, kind: input, shape index: {}]   ;;  %s5074_s5 = inlined_call_operand.vmem [shape: f32[1,128], index: 5, kind: input, shape index: {}]   ;;  %s5075_s6 = inlined_call_operand.hbm [shape: bf16[128,128], index: 6, kind: input, shape index: {}]   ;;  %s5076_s7 = inlined_call_operand.hbm [shape: bf16[128,128], index: 7, kind: input, shape index: {}]   ;;  %s5077_s8 = inlined_call_operand.vmem [shape: f32[128,1], index: 8, kind: input, shape index: {}]   ;;  %s5078_s9 = inlined_call_operand.hbm [shape: bf16[2,128,256], index: 9, kind: output, shape index: {}]  }
   0x1   :  { %5091 = sst [smem:[#allocation23_spill]] %s5071_s2 }
   0x2   :  { %5092 = sst [smem:[#allocation24_spill]] %s5077_s8 }
   0x3   :  { %5093 = sst [smem:[#allocation25_spill]] %s5078_s9 }
   0x4   :  { %14 = vsyncpa [#allocation4], 0 }
   0x5   :  { %15 = vsyncpa [#allocation7], 0 }
   0x6   :  { %16 = vsyncpa [#allocation10], 0 }
   0x7   :  { %17 = vsyncpa [#allocation5], 0 }
   0x8   :  { %19 = vsyncpa [#allocation5 + $0x1], 0  ;;  %s4201_s30 = smov 0   ;;  %s4203_s10 = smov 0  }
   0x9   :  { %s4205_s11 = smov 0   ;;  %s4207_s12 = smov 0  }
   0xa   :  { %s4209_s13 = smov 0   ;;  %s4211_s14 = smov 0  }
   0xb LB: > { %5094 = sst [smem:[#allocation17_spill]] %s4113_s30  ;;  %s2964_s15 = sadd.s32 4294967295, %s4133_s14   ;;  %s4133_s14 = sphi %s4211_s14, %s25_s14   ;;  %s4129_s13 = sphi %s4209_s13, %s5126_s13   ;;  %s4125_s12 = sphi %s4207_s12, %s5125_s12   ;;  %s4121_s11 = sphi %s4205_s11, %s5124_s11   ;;  %s4117_s10 = sphi %s4203_s10, %s5123_s10   ;;  %s4113_s30 = sphi %s4201_s30, %s5122_s30  }
   0xc   : > { %5095 = sst [smem:[#allocation18_spill]] %s4125_s12  ;;  %s2965_s16 = sadd.s32 4294967294, %s4133_s14  }
   0xd   : > { %s34_s17 = sadd.s32 1, %s4129_s13  ;;  %s46_s18 = sadd.s32 1, %s4121_s11 }
   0xe   : > { %p35_p0 = scmp.ge.s32.totalorder %s34_s17, 2  ;;  %p53_p1 = scmp.ne.s32.totalorder %s4121_s11, %s4117_s10 }
   0xf   : > { %p54_p2 = scmp.eq.s32.totalorder %s4133_s14, 0  ;;  %p258_p3 = scmp.eq.s32.totalorder %s2964_s15, 1 }
  0x10   : > { %s5128_s17 = smov (%p35_p0, %s34_s17), 0  ;;  %p263_p6 = scmp.ne.s32.totalorder %s4117_s10, %s4113_s30 }
  0x11   : > { %5096 = sst [smem:[#allocation19_spill]] %s5128_s17  ;;  %p4240_p4 = por %p54_p2, %p53_p1 }
  0x12   : > { %p4244_p5 = por %p258_p3, %p53_p1  ;;  %s42_s21 = ssub.s32 %s4129_s13, %s5128_s17 }
  0x13   : > { %s5097_s19 = scalar_select %p4240_p4, 1, 0 }
  0x14   : > { %s5098_s20 = scalar_select %p4244_p5, 1, 0 }
  0x15   : > { %p44_p7 = scmp.eq.s32.totalorder %s42_s21, 0  ;;  %p264_p8 = scmp.eq.s32.totalorder %s2965_s16, 1 }
  0x16   : > { %5099 = sst [smem:[#allocation20_spill]] %s5098_s20  ;;  %p2966_p9 = scmp.ge.s32.totalorder %s4133_s14, 1 }
  0x17   : > { %p271_p10 = scmp.lt.s32.totalorder %s4133_s14, 3  ;;  %p4257_p11 = por %p264_p8, %p263_p6 }
  0x18   : > { %s4255_s22 = scalar_select %p44_p7, %s4121_s11, %s46_s18  }
  0x19   : > { %s5101_s23 = scalar_select %p4257_p11, 1, 0 }
  0x1a   : > { %5100 = sst [smem:[#allocation21_spill]] %s4255_s22  ;;  %p4261_p12 = pnand %p2966_p9, %p271_p10 }
  0x1b   : > { %5102 = sst [smem:[#allocation22_spill]] %s5101_s23  ;;  %p4265_p13 = scmp.eq.s32.totalorder %s2964_s15, 0 }
  0x1c   : > { %s5103_s24 = scalar_select %p4261_p12, 1, 0 }
  0x1d   : > { %s5104_s25 = scalar_select %p4265_p13, 1, 0 }
  0x1e   : > { %p3721_p0 = pneg %p4261_p12  ;;  %s4135_s27 = smov [#allocation6]  }
  0x1f   : > { %s300_s28 = sshll.u32 %s4135_s27, 4  ;;  %s4136_s29 = smov [#allocation9]   ;;  %s301_s28 = int_to_ptr.vmem [resolvable:$true] %s300_s28 }
  0x20   : > { %p4273_p1 = pnand %p4265_p13, %p3721_p0  ;;  %s332_s16 = sshll.u32 %s4136_s29, 4  ;;  %s333_s16 = int_to_ptr.vmem [resolvable:$true] %s332_s16 }
  0x21   : > { %s5106_s2 = sld [smem:[#allocation23_spill]] }
  0x22   : > { %p4285_p3 = pneg %p4273_p1 }
  0x27   : > { %s3903_s15 = scalar_lea.hbm %s5106_s2, 2048 }
  0x28   : > { %p3904_p2 = scmp.ne.s32.totalorder %s5106_s2, %s3903_s15  ;;  %p3910_p8 = scmp.lt.u32.totalorder %s3903_s15, %s5106_s2 }
  0x2a   : > { %p3906_p6 = pnand %p4285_p3, %p3904_p2 }
  0x2c   : > { %p3907_p7 = pneg %p3906_p6 }
  0x2e   : > { %p3912_p9 = pnand %p3910_p8, %p3907_p7 }
  0x30   : > { %3915 = shalt.err (!%p3912_p9)
}
  0x31   : > { %s3916_s29 = scalar_lea.vmem %s301_s28, 2048  ;;  %p3924_p5 = scmp.lt.s32.totalorder %s301_s28, %s301_s28 }
  0x32   : > { %p3917_p10 = scmp.ne.s32.totalorder %s301_s28, %s3916_s29  ;;  %p3925_p13 = scmp.lt.s32.totalorder %s3916_s29, %s3916_s29 }
  0x34   : > { %p3919_p0 = pnand %p3917_p10, %p4285_p3  ;;  %p3926_p12 = por %p3925_p13, %p3924_p5 }
  0x36   : > { %p3920_p11 = pneg %p3919_p0 }
  0x38   : > { %p3927_p4 = pnand %p3926_p12, %p3920_p11 }
  0x3a   : > { %3930 = shalt.err (!%p3927_p4)
}
  0x3b   : > { %s5090_s17 = smov 64   ;;  %s4138_s22 = smov 4  }
  0x3c   : > { %3727 = dma.hbm_to_vmem [thread:$0]  (!%p4273_p1), %s5106_s2, 2048, %s301_s28, [#allocation7], %s5090_s17, %s5090_s17, %s4138_s22  }
  0x3d   : > { %s3931_s27 = scalar_lea.hbm %s5075_s6, 1024 }
  0x3e   : > { %p3932_p4 = scmp.ne.s32.totalorder %s5075_s6, %s3931_s27  ;;  %p3938_p12 = scmp.lt.u32.totalorder %s3931_s27, %s5075_s6 }
  0x40   : > { %p3934_p5 = pnand %p3932_p4, %p4285_p3 }
  0x42   : > { %p3935_p11 = pneg %p3934_p5 }
  0x44   : > { %p3940_p13 = pnand %p3938_p12, %p3935_p11 }
  0x46   : > { %3943 = shalt.err (!%p3940_p13)
}
  0x47   : > { %s3944_s30 = scalar_lea.vmem %s333_s16, 1024  ;;  %p3952_p8 = scmp.lt.s32.totalorder %s333_s16, %s333_s16 }
  0x48   : > { %p3945_p2 = scmp.ne.s32.totalorder %s333_s16, %s3944_s30  ;;  %p3953_p9 = scmp.lt.s32.totalorder %s3944_s30, %s3944_s30 }
  0x4a   : > { %p3947_p6 = pnand %p3945_p2, %p4285_p3  ;;  %p3954_p10 = por %p3953_p9, %p3952_p8 }
  0x4c   : > { %p3948_p7 = pneg %p3947_p6 }
  0x4e   : > { %p3955_p0 = pnand %p3954_p10, %p3948_p7 }
  0x50   : > { %3958 = shalt.err (!%p3955_p0)
}
  0x51   : > { %3733 = dma.hbm_to_vmem [thread:$0]  (!%p4273_p1), %s5075_s6, 1024, %s333_s16, [#allocation10], %s5090_s17, %s5090_s17, %s4138_s22  }
  0x52   : > { %s4139_s20 = smov [#allocation3]   ;;  %s4140_s18 = smov [#allocation8]  }
  0x53   : > { %s287_s28 = sshll.u32 %s4139_s20, 4  ;;  %s313_s21 = sshll.u32 %s4140_s18, 4  ;;  %s288_s28 = int_to_ptr.vmem [resolvable:$true] %s287_s28  ;;  %s314_s21 = int_to_ptr.vmem [resolvable:$true] %s313_s21 }
  0x54   : > { %s3959_s29 = scalar_lea.hbm %s5070_s1, 256 }
  0x55   : > { %p3960_p4 = scmp.ne.s32.totalorder %s5070_s1, %s3959_s29  ;;  %p3966_p12 = scmp.lt.u32.totalorder %s3959_s29, %s5070_s1 }
  0x57   : > { %p3962_p5 = pnand %p3960_p4, %p4285_p3 }
  0x59   : > { %p3963_p11 = pneg %p3962_p5 }
  0x5b   : > { %p3968_p13 = pnand %p3966_p12, %p3963_p11 }
  0x5d   : > { %3971 = shalt.err (!%p3968_p13)
}
  0x5e   : > { %s3972_s16 = scalar_lea.vmem %s288_s28, 256  ;;  %p3980_p8 = scmp.lt.s32.totalorder %s288_s28, %s288_s28 }
  0x5f   : > { %p3973_p2 = scmp.ne.s32.totalorder %s288_s28, %s3972_s16  ;;  %p3981_p9 = scmp.lt.s32.totalorder %s3972_s16, %s3972_s16 }
  0x61   : > { %p3975_p6 = pnand %p3973_p2, %p4285_p3  ;;  %p3982_p10 = por %p3981_p9, %p3980_p8 }
  0x63   : > { %p3976_p7 = pneg %p3975_p6 }
  0x65   : > { %p3983_p0 = pnand %p3982_p10, %p3976_p7 }
  0x67   : > { %3986 = shalt.err (!%p3983_p0)
}
  0x68   : > { %3724 = dma.hbm_to_vmem [thread:$0]  (!%p4273_p1), %s5070_s1, 256, %s288_s28, [#allocation4], %s5090_s17, %s5090_s17, %s4138_s22  }
  0x69   : > { %s3987_s18 = scalar_lea.hbm %s5072_s3, 2048 }
  0x6a   : > { %p3988_p4 = scmp.ne.s32.totalorder %s5072_s3, %s3987_s18  ;;  %p3994_p12 = scmp.lt.u32.totalorder %s3987_s18, %s5072_s3 }
  0x6c   : > { %p3990_p5 = pnand %p3988_p4, %p4285_p3 }
  0x6e   : > { %p3991_p11 = pneg %p3990_p5 }
  0x70   : > { %p3996_p13 = pnand %p3994_p12, %p3991_p11 }
  0x72   : > { %3999 = shalt.err (!%p3996_p13)
}
  0x73   : > { %s4000_s9 = scalar_lea.vmem %s314_s21, 2048  ;;  %p4008_p8 = scmp.lt.s32.totalorder %s314_s21, %s314_s21 }
  0x74   : > { %p4001_p2 = scmp.ne.s32.totalorder %s314_s21, %s4000_s9  ;;  %p4009_p9 = scmp.lt.s32.totalorder %s4000_s9, %s4000_s9 }
  0x76   : > { %p4003_p6 = pnand %p4001_p2, %p4285_p3  ;;  %p4010_p10 = por %p4009_p9, %p4008_p8 }
  0x78   : > { %p4004_p7 = pneg %p4003_p6 }
  0x7a   : > { %p4011_p0 = pnand %p4010_p10, %p4004_p7 }
  0x7c   : > { %4014 = shalt.err (!%p4011_p0)
}
  0x7d   : > { %s4141_s28 = smov 128   ;;  %s4142_s16 = smov 8  }
  0x7e   : > { %3730 = dma.hbm_to_vmem [thread:$0]  (!%p4273_p1), %s5072_s3, 2048, %s314_s21, [#allocation7], %s4141_s28, %s4141_s28, %s4142_s16  }
  0x7f   : > { %s4143_s12 = smov [#allocation11]   ;;  %s4015_s27 = scalar_lea.hbm %s5076_s7, 1024 }
  0x80   : > { %s345_s20 = sshll.u32 %s4143_s12, 4  ;;  %p4016_p4 = scmp.ne.s32.totalorder %s5076_s7, %s4015_s27  ;;  %s346_s20 = int_to_ptr.vmem [resolvable:$true] %s345_s20 }
  0x81   : > { %p4022_p12 = scmp.lt.u32.totalorder %s4015_s27, %s5076_s7 }
  0x82   : > { %p4018_p5 = pnand %p4016_p4, %p4285_p3 }
  0x84   : > { %p4019_p11 = pneg %p4018_p5 }
  0x86   : > { %p4024_p13 = pnand %p4022_p12, %p4019_p11 }
  0x88   : > { %4027 = shalt.err (!%p4024_p13)
}
  0x89   : > { %s4028_s21 = scalar_lea.vmem %s346_s20, 1024  ;;  %p4036_p8 = scmp.lt.s32.totalorder %s346_s20, %s346_s20 }
  0x8a   : > { %p4029_p2 = scmp.ne.s32.totalorder %s346_s20, %s4028_s21  ;;  %p4037_p9 = scmp.lt.s32.totalorder %s4028_s21, %s4028_s21 }
  0x8c   : > { %p4031_p6 = pnand %p4029_p2, %p4285_p3  ;;  %p4038_p10 = por %p4037_p9, %p4036_p8 }
  0x8e   : > { %p4032_p7 = pneg %p4031_p6 }
  0x90   : > { %p4039_p0 = pnand %p4038_p10, %p4032_p7 }
  0x92   : > { %4042 = shalt.err (!%p4039_p0)
}
  0x93   : > { %s5108_s28 = smov 64   ;;  %p2972_p4 = scmp.ge.s32.totalorder %s4133_s14, 2 }
  0x94   : > { %3736 = dma.hbm_to_vmem [thread:$0]  (!%p4273_p1), %s5076_s7, 1024, %s346_s20, [#allocation10], %s5108_s28, %s5108_s28, %s4138_s22  }
  0x95   : > { %358 = sbr.rel (%p2972_p4) target bundleno = 181 (0xb5), region = 48  ;;  %p5109_p3 = scmp.ne.s32.totalorder (!%p2972_p4), %s5097_s19, 0 }
  0x9c   : > { %361 = sbr.rel (!%p5109_p3) target bundleno = 181 (0xb5), region = 52  ;;  %s363_s23 = sand.u32 (%p5109_p3), 1, %s4121_s11  }
  0x9d   : > { %s2974_s2 = sshll.u32 (%p5109_p3), %s4129_s13, 2  ;;  %s2973_s26 = sshll.u32 (%p5109_p3), %s363_s23, 7 }
  0x9e   : > { %s4395_s18 = scalar_lea.vmem (%p5109_p3), %s5069_s0, %s2974_s2  ;;  %s4399_s19 = scalar_lea.vmem (%p5109_p3), [#allocation2], %s2973_s26 }
  0x9f   : > { %v386_v0 = vld [vmem:[%s4395_s18] sm:$0xf] (%p5109_p3)  ;;  %v388_v1 = vld [vmem:[%s4395_s18 + $0x8] sm:$0xf] (%p5109_p3)  ;;  %v390_v2 = vld [vmem:[%s4395_s18 + $0x10] sm:$0xf] (%p5109_p3) }
  0xa0   : > { %387 = vst [vmem:[%s4399_s19] sm:$0xf] (%p5109_p3), %v386_v0  ;;  %389 = vst [vmem:[%s4399_s19 + $0x4] sm:$0xf] (%p5109_p3), %v388_v1  ;;  %v392_v3 = vld [vmem:[%s4395_s18 + $0x18] sm:$0xf] (%p5109_p3) }
  0xa1   : > { %v394_v4 = vld [vmem:[%s4395_s18 + $0x20] sm:$0xf] (%p5109_p3)  ;;  %391 = vst [vmem:[%s4399_s19 + $0x8] sm:$0xf] (%p5109_p3), %v390_v2  ;;  %393 = vst [vmem:[%s4399_s19 + $0xc] sm:$0xf] (%p5109_p3), %v392_v3 }
  0xa2   : > { %395 = vst [vmem:[%s4399_s19 + $0x10] sm:$0xf] (%p5109_p3), %v394_v4  ;;  %v396_v5 = vld [vmem:[%s4395_s18 + $0x28] sm:$0xf] (%p5109_p3)  ;;  %v398_v6 = vld [vmem:[%s4395_s18 + $0x30] sm:$0xf] (%p5109_p3) }
  0xa3   : > { %v400_v7 = vld [vmem:[%s4395_s18 + $0x38] sm:$0xf]  ;;  %397 = vst [vmem:[%s4399_s19 + $0x14] sm:$0xf] %v396_v5  ;;  %399 = vst [vmem:[%s4399_s19 + $0x18] sm:$0xf] %v398_v6 }
  0xa4   : > { %401 = vst [vmem:[%s4399_s19 + $0x1c] sm:$0xf] %v400_v7  ;;  %v402_v8 = vld [vmem:[%s4395_s18 + $0x40] sm:$0xf]  ;;  %v404_v9 = vld [vmem:[%s4395_s18 + $0x48] sm:$0xf] }
  0xa5   : > { %v406_v10 = vld [vmem:[%s4395_s18 + $0x50] sm:$0xf]  ;;  %403 = vst [vmem:[%s4399_s19 + $0x20] sm:$0xf] %v402_v8  ;;  %405 = vst [vmem:[%s4399_s19 + $0x24] sm:$0xf] %v404_v9 }
  0xa6   : > { %407 = vst [vmem:[%s4399_s19 + $0x28] sm:$0xf] %v406_v10  ;;  %v408_v11 = vld [vmem:[%s4395_s18 + $0x58] sm:$0xf]  ;;  %v410_v12 = vld [vmem:[%s4395_s18 + $0x60] sm:$0xf] }
  0xa7   : > { %v412_v13 = vld [vmem:[%s4395_s18 + $0x68] sm:$0xf]  ;;  %409 = vst [vmem:[%s4399_s19 + $0x2c] sm:$0xf] %v408_v11  ;;  %411 = vst [vmem:[%s4399_s19 + $0x30] sm:$0xf] %v410_v12 }
  0xa8   : > { %413 = vst [vmem:[%s4399_s19 + $0x34] sm:$0xf] %v412_v13  ;;  %v414_v14 = vld [vmem:[%s4395_s18 + $0x70] sm:$0xf]  ;;  %v416_v15 = vld [vmem:[%s4395_s18 + $0x78] sm:$0xf] }
  0xa9   : > { %v418_v16 = vld [vmem:[%s4395_s18 + $0x80] sm:$0xf]  ;;  %415 = vst [vmem:[%s4399_s19 + $0x38] sm:$0xf] %v414_v14  ;;  %417 = vst [vmem:[%s4399_s19 + $0x3c] sm:$0xf] %v416_v15 }
  0xaa   : > { %419 = vst [vmem:[%s4399_s19 + $0x40] sm:$0xf] %v418_v16  ;;  %v420_v17 = vld [vmem:[%s4395_s18 + $0x88] sm:$0xf]  ;;  %v422_v18 = vld [vmem:[%s4395_s18 + $0x90] sm:$0xf] }
  0xab   : > { %v424_v19 = vld [vmem:[%s4395_s18 + $0x98] sm:$0xf]  ;;  %421 = vst [vmem:[%s4399_s19 + $0x44] sm:$0xf] %v420_v17  ;;  %423 = vst [vmem:[%s4399_s19 + $0x48] sm:$0xf] %v422_v18 }
  0xac   : > { %425 = vst [vmem:[%s4399_s19 + $0x4c] sm:$0xf] %v424_v19  ;;  %v426_v20 = vld [vmem:[%s4395_s18 + $0xa0] sm:$0xf]  ;;  %v428_v21 = vld [vmem:[%s4395_s18 + $0xa8] sm:$0xf] }
  0xad   : > { %v430_v22 = vld [vmem:[%s4395_s18 + $0xb0] sm:$0xf]  ;;  %427 = vst [vmem:[%s4399_s19 + $0x50] sm:$0xf] %v426_v20  ;;  %429 = vst [vmem:[%s4399_s19 + $0x54] sm:$0xf] %v428_v21 }
  0xae   : > { %431 = vst [vmem:[%s4399_s19 + $0x58] sm:$0xf] %v430_v22  ;;  %v432_v23 = vld [vmem:[%s4395_s18 + $0xb8] sm:$0xf]  ;;  %v434_v24 = vld [vmem:[%s4395_s18 + $0xc0] sm:$0xf] }
  0xaf   : > { %v436_v25 = vld [vmem:[%s4395_s18 + $0xc8] sm:$0xf]  ;;  %433 = vst [vmem:[%s4399_s19 + $0x5c] sm:$0xf] %v432_v23  ;;  %435 = vst [vmem:[%s4399_s19 + $0x60] sm:$0xf] %v434_v24 }
  0xb0   : > { %437 = vst [vmem:[%s4399_s19 + $0x64] sm:$0xf] %v436_v25  ;;  %v438_v26 = vld [vmem:[%s4395_s18 + $0xd0] sm:$0xf]  ;;  %v440_v27 = vld [vmem:[%s4395_s18 + $0xd8] sm:$0xf] }
  0xb1   : > { %v442_v28 = vld [vmem:[%s4395_s18 + $0xe0] sm:$0xf]  ;;  %439 = vst [vmem:[%s4399_s19 + $0x68] sm:$0xf] %v438_v26  ;;  %441 = vst [vmem:[%s4399_s19 + $0x6c] sm:$0xf] %v440_v27 }
  0xb2   : > { %443 = vst [vmem:[%s4399_s19 + $0x70] sm:$0xf] %v442_v28  ;;  %v444_v29 = vld [vmem:[%s4395_s18 + $0xe8] sm:$0xf]  ;;  %v446_v30 = vld [vmem:[%s4395_s18 + $0xf0] sm:$0xf] }
  0xb3   : > { %v448_v31 = vld [vmem:[%s4395_s18 + $0xf8] sm:$0xf]  ;;  %445 = vst [vmem:[%s4399_s19 + $0x74] sm:$0xf] %v444_v29  ;;  %447 = vst [vmem:[%s4399_s19 + $0x78] sm:$0xf] %v446_v30 }
  0xb4   : > { %449 = vst [vmem:[%s4399_s19 + $0x7c] sm:$0xf] %v448_v31 }
  0xb5 PF: > { %p5110_p1 = scmp.ne.s32.totalorder %s5103_s24, 0 }
  0xb6   : > { %s542_s22 = sand.u32 (!%p5110_p1), 1, %s4117_s10   ;;  %p5111_p5 = scmp.ne.s32.totalorder (!%p5110_p1), %s5104_s25, 0 }
  0xb7   : > { %539 = sbr.rel (%p5110_p1) target bundleno = 1372 (0x55c), region = 93  ;;  %s4468_s20 = sshll.u32 (!%p5110_p1), %s542_s22, 7 }
  0xb8   : > { %s4471_s15 = scalar_lea.vmem (!%p5110_p1), [#allocation2], %s4468_s20 }
  0xbe   : > { %4096 = dma.done.wait (%p5111_p5), [#allocation4], 256  }
  0xbf   : > { %4098 = vsyncadd (%p5111_p5), [#allocation4], 4294967040 }
  0xc0   : > { %4100 = dma.done.wait (%p5111_p5), [#allocation7], 4096  }
  0xc1   : > { %4102 = vsyncadd (%p5111_p5), [#allocation7], 4294963200 }
  0xc2   : > { %4104 = dma.done.wait (%p5111_p5), [#allocation10], 2048  }
  0xc3   : > { %4106 = vsyncadd (%p5111_p5), [#allocation10], 4294965248  ;;  %v4144_v32 = vmov 0   ;;  %v4488_v33 = vld [vmem:[#allocation8 + $0x4] ss:$8 sps:$4 sm:$0xff]   ;;  %v3842_v49 = vld [vmem:[%s4471_s15] sm:$0xff]  }
  0xc4   : > { %1016 = vmatprep.mubr.bf16.mxu1 %v4144_v32  ;;  %3815 = vset.pattern.permute.xlu0 %v4144_v32  ;;  %v4490_v34 = vld [vmem:[#allocation8] ss:$8 sps:$4 sm:$0xff]   ;;  %v4493_v35 = vld [vmem:[#allocation8 + $0x14] ss:$8 sps:$4 sm:$0xff]   ;;  %v4496_v36 = vld [vmem:[#allocation8 + $0x10] ss:$8 sps:$4 sm:$0xff]  }
  0xc5   : > { %3816 = vset.pattern.permute.xlu1 %v4144_v32  ;;  %984 = vmatprep.subr.bf16.mxu1 %v4488_v33  ;;  %v4499_v37 = vld [vmem:[#allocation8 + $0x24] ss:$8 sps:$4 sm:$0xff]   ;;  %v4502_v38 = vld [vmem:[#allocation8 + $0x20] ss:$8 sps:$4 sm:$0xff]   ;;  %v4505_v39 = vld [vmem:[#allocation8 + $0x34] ss:$8 sps:$4 sm:$0xff]  }
  0xc6   : > { %985 = vmatpush1.bf16.msra.mxu1 %v4490_v34  ;;  %v4508_v40 = vld [vmem:[#allocation8 + $0x30] ss:$8 sps:$4 sm:$0xff]   ;;  %v4511_v41 = vld [vmem:[#allocation8 + $0x44] ss:$8 sps:$4 sm:$0xff]   ;;  %v4514_v42 = vld [vmem:[#allocation8 + $0x40] ss:$8 sps:$4 sm:$0xff]  }
  0xc7   : > { %986 = vmatprep.subr.bf16.mxu1 %v4493_v35  ;;  %v4517_v43 = vld [vmem:[#allocation8 + $0x54] ss:$8 sps:$4 sm:$0xff]   ;;  %v4520_v44 = vld [vmem:[#allocation8 + $0x50] ss:$8 sps:$4 sm:$0xff]   ;;  %v4523_v45 = vld [vmem:[#allocation8 + $0x64] ss:$8 sps:$4 sm:$0xff]  }
  0xc8   : > { %v4526_v46 = vld [vmem:[#allocation8 + $0x60] ss:$8 sps:$4 sm:$0xff]   ;;  %v4529_v47 = vld [vmem:[#allocation8 + $0x74] ss:$8 sps:$4 sm:$0xff]   ;;  %v4531_v48 = vld [vmem:[#allocation8 + $0x70] ss:$8 sps:$4 sm:$0xff]  }
  0xc9   : > { %v3841_v50 = vld [vmem:[#allocation3] sm:$0xff]   ;;  %v4536_v51 = vld [vmem:[#allocation6] sm:$0xff]   ;;  %v3843_v52 = vld [vmem:[%s4471_s15 + $0x8] sm:$0xff]   ;;  %v4145_v8 = vmov 0.0   ;;  %vm4146_vm0 = vmmov 0   ;;  %s5112_s24 = sld [smem:[#allocation24_spill]] }
  0xca   : > { %987 = vmatpush1.bf16.msra.mxu1 %v4496_v36  ;;  %v3844_v53 = vld [vmem:[%s4471_s15 + $0x10] sm:$0xff]   ;;  %v3845_v54 = vld [vmem:[%s4471_s15 + $0x18] sm:$0xff]   ;;  %v3846_v55 = vld [vmem:[%s4471_s15 + $0x20] sm:$0xff]   ;;  %3443 = vmatprep.subr.bf16.mxu0 %v4145_v8  ;;  %vm1749_vm1 = vcmask 130048   ;;  %s5114_s27 = sld [smem:[#allocation20_spill]]  ;;  %s5115_s21 = sld [smem:[#allocation25_spill]] }
  0xcb   : > { %988 = vmatprep.subr.bf16.mxu1 %v4499_v37  ;;  %v3847_v56 = vld [vmem:[%s4471_s15 + $0x28] sm:$0xff]   ;;  %v3848_v57 = vld [vmem:[%s4471_s15 + $0x30] sm:$0xff]   ;;  %v3849_v58 = vld [vmem:[%s4471_s15 + $0x38] sm:$0xff]   ;;  %3459 = vmatprep.mubr.msk.bf16.mxu0 %vm4146_vm0, %v4145_v8  ;;  %s5022_s17 = scalar_lea.sflag [#allocation5], %s542_s22  ;;  %s4147_s23 = smov [#allocation12]  }
  0xcc   : > { %v4547_v59 = vld [vmem:[#allocation6 + $0x8] sm:$0xff]   ;;  %v4549_v60 = vld [vmem:[#allocation6 + $0x10] sm:$0xff]   ;;  %v4553_v61 = vld [vmem:[#allocation6 + $0x18] sm:$0xff]   ;;  %s4047_s2 = sshll.u32 %s4147_s23, 4  ;;  %s4048_s2 = int_to_ptr.vmem [resolvable:$false] %s4047_s2 }
  0xcd   : > { %v4555_v62 = vld [vmem:[#allocation6 + $0x20] sm:$0xff]   ;;  %v4559_v63 = vld [vmem:[#allocation6 + $0x28] sm:$0xff]   ;;  %v4561_v0 = vld [vmem:[#allocation6 + $0x30] sm:$0xff]   ;;  %s4049_s26 = scalar_lea.vmem %s4048_s2, 4096 }
  0xce   : > { %989 = vmatpush1.bf16.msra.mxu1 %v4502_v38  ;;  %v4565_v1 = vld [vmem:[#allocation6 + $0x38] sm:$0xff]   ;;  %v4568_v2 = vld [vmem:[#allocation6 + $0x40] sm:$0xff]   ;;  %v4570_v3 = vld [vmem:[#allocation6 + $0x48] sm:$0xff]  }
  0xcf   : > { %990 = vmatprep.subr.bf16.mxu1 %v4505_v39  ;;  %v4572_v4 = vld [vmem:[#allocation6 + $0x50] sm:$0xff]   ;;  %v4577_v5 = vld [vmem:[#allocation6 + $0x58] sm:$0xff]   ;;  %v4580_v6 = vld [vmem:[#allocation6 + $0x60] sm:$0xff]  }
  0xd0   : > { %v4582_v7 = vld [vmem:[#allocation6 + $0x68] sm:$0xff]   ;;  %v4587_v9 = vld [vmem:[#allocation6 + $0x70] sm:$0xff]   ;;  %v4589_v10 = vld [vmem:[#allocation6 + $0x78] sm:$0xff]   ;;  %p5116_p12 = scmp.ne.s32.totalorder %s5114_s27, 0 }
  0xd1   : > { %v681_v11 = vld [vmem:[%s5073_s4] sm:$0xff]  ;;  %v682_v12 = vld [vmem:[%s5073_s4 + $0x8] sm:$0xff]  ;;  %v683_v13 = vld [vmem:[%s5073_s4 + $0x10] sm:$0xff] }
  0xd2   : > { %991 = vmatpush1.bf16.msra.mxu1 %v4508_v40  ;;  %699 = vperm.xlu0 %3815, %v681_v11   ;;  %v685_v14 = vld [vmem:[%s5073_s4 + $0x20] sm:$0xff]  ;;  %v684_v15 = vld [vmem:[%s5073_s4 + $0x18] sm:$0xff]  ;;  %v687_v16 = vld [vmem:[%s5073_s4 + $0x30] sm:$0xff] }
  0xd3   : > { %992 = vmatprep.subr.bf16.mxu1 %v4511_v41  ;;  %709 = vperm.xlu1 %3816, %v683_v13   ;;  %v686_v17 = vld [vmem:[%s5073_s4 + $0x28] sm:$0xff]  ;;  %v689_v18 = vld [vmem:[%s5073_s4 + $0x40] sm:$0xff]  ;;  %v688_v19 = vld [vmem:[%s5073_s4 + $0x38] sm:$0xff] }
  0xd4   : > { %v691_v20 = vld [vmem:[%s5073_s4 + $0x50] sm:$0xff]  ;;  %v690_v21 = vld [vmem:[%s5073_s4 + $0x48] sm:$0xff]  ;;  %v693_v22 = vld [vmem:[%s5073_s4 + $0x60] sm:$0xff] }
  0xd5   : > { %v692_v23 = vld [vmem:[%s5073_s4 + $0x58] sm:$0xff]  ;;  %v695_v24 = vld [vmem:[%s5073_s4 + $0x70] sm:$0xff]  ;;  %v4640_v25 = vld [vmem:[%s5074_s5] ss:$0 sm:$0xff] }
  0xd6   : > { %993 = vmatpush1.bf16.msra.mxu1 %v4514_v42  ;;  %704 = vperm.xlu0 %3815, %v682_v12   ;;  %v694_v26 = vld [vmem:[%s5073_s4 + $0x68] sm:$0xff]  ;;  %v784_v27 = vld [vmem:[%s5112_s24] sm:$0xff]  ;;  %v787_v12 = vld [vmem:[%s5112_s24 + $0x18] sm:$0xff] }
  0xd7   : > { %994 = vmatprep.subr.bf16.mxu1 %v4517_v43  ;;  %714 = vperm.xlu1 %3816, %v684_v15   ;;  %v790_v13 = vld [vmem:[%s5112_s24 + $0x30] sm:$0xff]  ;;  %v792_v15 = vld [vmem:[%s5112_s24 + $0x40] sm:$0xff] }
  0xda   : > { %995 = vmatpush1.bf16.msra.mxu1 %v4520_v44  ;;  %719 = vperm.xlu0 %3815, %v685_v14   ;;  %v789_v14 = vld [vmem:[%s5112_s24 + $0x28] sm:$0xff] }
  0xdb   : > { %996 = vmatprep.subr.bf16.mxu1 %v4523_v45  ;;  %724 = vperm.xlu1 %3816, %v686_v17   ;;  %v794_v17 = vld [vmem:[%s5112_s24 + $0x50] sm:$0xff] }
  0xde   : > { %997 = vmatpush1.bf16.msra.mxu1 %v4526_v46  ;;  %729 = vperm.xlu0 %3815, %v687_v16   ;;  %v791_v16 = vld [vmem:[%s5112_s24 + $0x38] sm:$0xff] }
  0xdf   : > { %998 = vmatprep.subr.bf16.mxu1 %v4529_v47  ;;  %734 = vperm.xlu1 %3816, %v688_v19   ;;  %v796_v19 = vld [vmem:[%s5112_s24 + $0x60] sm:$0xff] }
  0xe2   : > { %999 = vmatpush1.bf16.msra.mxu1 %v4531_v48  ;;  %739 = vperm.xlu0 %3815, %v689_v18   ;;  %v793_v18 = vld [vmem:[%s5112_s24 + $0x48] sm:$0xff] }
  0xe3   : > { %3395 = vmatprep.subr.bf16.mxu1 %v3842_v49  ;;  %744 = vperm.xlu1 %3816, %v690_v21   ;;  %v798_v21 = vld [vmem:[%s5112_s24 + $0x70] sm:$0xff] }
  0xe5   : > { %1017 = vmatmul.mubr.bf16.vlgmr.msra.gmra.mrb[0].mxu1 %v3841_v50 }
  0xe6   : > { %3396 = vmatpush3.bf16.msra.mxu1 %v3842_v49  ;;  %3411 = vmatprep.mubr.bf16.mxu1 %v4536_v51 }
  0xe7   : > { %3397 = vmatprep.subr.bf16.mxu1 %v3843_v52  ;;  %749 = vperm.xlu0 %3815, %v691_v20   ;;  %v795_v20 = vld [vmem:[%s5112_s24 + $0x58] sm:$0xff] }
  0xe8   : > { %754 = vperm.xlu1 %3816, %v692_v23  }
  0xea   : > { %3398 = vmatpush3.bf16.msra.mxu1 %v3843_v52  ;;  %v696_v52 = vld [vmem:[%s5073_s4 + $0x78] sm:$0xff] }
  0xeb   : > { %3399 = vmatprep.subr.bf16.mxu1 %v3844_v53  ;;  %759 = vperm.xlu0 %3815, %v693_v22   ;;  %v797_v22 = vld [vmem:[%s5112_s24 + $0x68] sm:$0xff] }
  0xec   : > { %764 = vperm.xlu1 %3816, %v694_v26  }
  0xee   : > { %3400 = vmatpush3.bf16.msra.mxu1 %v3844_v53  ;;  %v786_v53 = vld [vmem:[%s5112_s24 + $0x10] sm:$0xff] }
  0xef   : > { %3401 = vmatprep.subr.bf16.mxu1 %v3845_v54  ;;  %769 = vperm.xlu0 %3815, %v695_v24  }
  0xf0   : > { %774 = vperm.xlu1 %3816, %v696_v52  }
  0xf2   : > { %3402 = vmatpush3.bf16.msra.mxu1 %v3845_v54 }
  0xf3   : > { %3403 = vmatprep.subr.bf16.mxu1 %v3846_v55  ;;  %802 = vperm.xlu0 %3815, %v784_v27   ;;  %v799_v27 = vld [vmem:[%s5112_s24 + $0x78] sm:$0xff] }
  0xf6   : > { %3404 = vmatpush3.bf16.msra.mxu1 %v3846_v55 }
  0xf7   : > { %3405 = vmatprep.subr.bf16.mxu1 %v3847_v56  ;;  %812 = vperm.xlu0 %3815, %v786_v53  }
  0xfa   : > { %3406 = vmatpush3.bf16.msra.mxu1 %v3847_v56 }
  0xfb   : > { %3407 = vmatprep.subr.bf16.mxu1 %v3848_v57 }
  0xfe   : > { %3408 = vmatpush3.bf16.msra.mxu1 %v3848_v57  ;;  %v785_v57 = vld [vmem:[%s5112_s24 + $0x8] sm:$0xff] }
  0xff   : > { %3409 = vmatprep.subr.bf16.mxu1 %v3849_v58  ;;  %807 = vperm.xlu1 %3816, %v785_v57  }
 0x102   : > { %3410 = vmatpush3.bf16.msra.mxu1 %v3849_v58  ;;  %v788_v58 = vld [vmem:[%s5112_s24 + $0x20] sm:$0xff] }
 0x103   : > { %822 = vperm.xlu0 %3815, %v788_v58   ;;  %817 = vperm.xlu1 %3816, %v787_v12  }
 0x105   : > { %3412 = vmatmul.mubr.bf16.vlgmr.msra.gmra.mrb[4].mxu1 %v4547_v59 }
 0x106   : > { %3415 = vmatprep.mubr.bf16.mxu1 %v4549_v60 }
 0x107   : > { %832 = vperm.xlu0 %3815, %v790_v13   ;;  %827 = vperm.xlu1 %3816, %v789_v14  }
 0x10b   : > { %842 = vperm.xlu0 %3815, %v792_v15   ;;  %837 = vperm.xlu1 %3816, %v791_v16  }
 0x10d   : > { %3416 = vmatmul.mubr.bf16.gmra.mrb[8].mxu1 %v4553_v61 }
 0x10e   : > { %3419 = vmatprep.mubr.bf16.mxu1 %v4555_v62 }
 0x10f   : > { %852 = vperm.xlu0 %3815, %v794_v17   ;;  %847 = vperm.xlu1 %3816, %v793_v18  }
 0x113   : > { %862 = vperm.xlu0 %3815, %v796_v19   ;;  %857 = vperm.xlu1 %3816, %v795_v20  }
 0x115   : > { %3420 = vmatmul.mubr.bf16.gmra.mrb[12].mxu1 %v4559_v63 }
 0x116   : > { %3423 = vmatprep.mubr.bf16.mxu1 %v4561_v0 }
 0x117   : > { %872 = vperm.xlu0 %3815, %v798_v21   ;;  %867 = vperm.xlu1 %3816, %v797_v22  }
 0x11b   : > { %877 = vperm.xlu1 %3816, %v799_v27   ;;  %v4727_v27 = vld [vmem:[#allocation9 + $0x10] sm:$0xff]  }
 0x11d   : > { %3424 = vmatmul.mubr.bf16.gmra.mrb[16].mxu1 %v4565_v1 }
 0x11e   : > { %3427 = vmatprep.mubr.bf16.mxu1 %v4568_v2 }
 0x125   : > { %3428 = vmatmul.mubr.bf16.gmra.mrb[20].mxu1 %v4570_v3 }
 0x126   : > { %3431 = vmatprep.mubr.bf16.mxu1 %v4572_v4 }
 0x12d   : > { %3432 = vmatmul.mubr.bf16.gmra.mrb[24].mxu1 %v4577_v5 }
 0x12e   : > { %3435 = vmatprep.mubr.bf16.mxu1 %v4580_v6 }
 0x135   : > { %3436 = vmatmul.mubr.bf16.gmra.mrb[28].mxu1 %v4582_v7 }
 0x136   : > { %3439 = vmatprep.mubr.bf16.mxu1 %v4587_v9 }
 0x13d   : > { %3440 = vmatmul.mubr.bf16.gmra.mrb[32].mxu1 %v4589_v10 }
 0x1b8   : > { %v4648_v28 = vpop.f32.mrb[0].mxu1 }
 0x1b9   : > { %v1020_v29 = vpop.f32.mrb[1].mxu1 }
 0x1ba   : > { %v1027_v30 = vadd.f32 %v4640_v25, %v1020_v29  ;;  %v4651_v31 = vpop.f32.mrb[2].mxu1 }
 0x1bb   : > { %v1368_v49 = vpack.c.bf16 %v4651_v31, %v4648_v28  ;;  %v1024_v50 = vpop.f32.mrb[3].mxu1  ;;  %v4733_v28 = vld [vmem:[#allocation9 + $0x18] sm:$0xff]   ;;  %v4736_v31 = vld [vmem:[#allocation9 + $0x20] sm:$0xff]  }
 0x1bc   : > { %v1028_v54 = vadd.f32 %v4640_v25, %v1024_v50  ;;  %v1029_v55 = vmax.f32 %v1027_v30, 0.0 }
 0x1be   : > { %v1030_v56 = vmax.f32 %v1028_v54, 0.0 }
 0x1c0   : > { %v4668_v11 = vpack.c.bf16 %v1030_v56, %v1029_v55 }
 0x1d8   : > { %v3413_v23 = vpop.f32.mrb[4].mxu1 }
 0x1d9   : > { %v1209_v24 = vpop.f32.mrb[5].mxu1 }
 0x1da   : > { %v3414_v26 = vpop.f32.mrb[6].mxu1 }
 0x1db   : > { %v1370_v29 = vpack.c.bf16 %v3414_v26, %v3413_v23  ;;  %v1212_v30 = vpop.f32.mrb[7].mxu1  ;;  %v4713_v23 = vld [vmem:[#allocation9] sm:$0xff]   ;;  %v4725_v26 = vld [vmem:[#allocation9 + $0x8] sm:$0xff]  }
 0x1dc   : > { %v1369_v50 = vpack.c.bf16 %v1212_v30, %v1209_v24  ;;  %v4720_v24 = vld [vmem:[#allocation11] sm:$0xff]   ;;  %v4759_v30 = vld [vmem:[#allocation9 + $0x38] sm:$0xff]  }
 0x1dd   : > { %3497 = vmatprep.mubr.bf16.mxu1 %v4720_v24 }
 0x1de   : > { %3444 = vmatpush3.bf16.msra.mxu0 %v1369_v50 }
 0x1df   : > { %3445 = vmatprep.subr.bf16.mxu0 %v4145_v8 }
 0x1e0   : > { %v3417_v52 = vpop.f32.mrb[8].mxu1 }
 0x1e1   : > { %v1225_v53 = vpop.f32.mrb[9].mxu1 }
 0x1e2   : > { %v3418_v54 = vpop.f32.mrb[10].mxu1  ;;  %3446 = vmatpush3.bf16.msra.mxu0 %v1370_v29 }
 0x1e3   : > { %v1372_v55 = vpack.c.bf16 %v3418_v54, %v3417_v52  ;;  %v1228_v56 = vpop.f32.mrb[11].mxu1  ;;  %3447 = vmatprep.subr.bf16.mxu0 %v4145_v8  ;;  %v4762_v52 = vpop.permute.xlu1 %709 }
 0x1e4   : > { %v1371_v57 = vpack.c.bf16 %v1228_v56, %v1225_v53 }
 0x1e6   : > { %3448 = vmatpush3.bf16.msra.mxu0 %v1371_v57 }
 0x1e7   : > { %3449 = vmatprep.subr.bf16.mxu0 %v4145_v8 }
 0x1e8   : > { %v3421_v58 = vpop.f32.mrb[12].mxu1 }
 0x1e9   : > { %v1241_v12 = vpop.f32.mrb[13].mxu1 }
 0x1ea   : > { %v3422_v13 = vpop.f32.mrb[14].mxu1  ;;  %3450 = vmatpush3.bf16.msra.mxu0 %v1372_v55 }
 0x1eb   : > { %v1374_v14 = vpack.c.bf16 %v3422_v13, %v3421_v58  ;;  %v1244_v15 = vpop.f32.mrb[15].mxu1  ;;  %3451 = vmatprep.subr.bf16.mxu0 %v4145_v8 }
 0x1ec   : > { %v1373_v16 = vpack.c.bf16 %v1244_v15, %v1241_v12 }
 0x1ee   : > { %3452 = vmatpush3.bf16.msra.mxu0 %v1373_v16  ;;  %v3876_v16 = vld [vmem:[%s4471_s15 + $0x48] sm:$0xff]  }
 0x1ef   : > { %3453 = vmatprep.subr.bf16.mxu0 %v4145_v8 }
 0x1f0   : > { %v3425_v17 = vpop.f32.mrb[16].mxu1 }
 0x1f1   : > { %v1257_v18 = vpop.f32.mrb[17].mxu1 }
 0x1f2   : > { %v3426_v19 = vpop.f32.mrb[18].mxu1  ;;  %3454 = vmatpush3.bf16.msra.mxu0 %v1374_v14  ;;  %v3874_v14 = vld [vmem:[#allocation3 + $0x8] sm:$0xff]  }
 0x1f3   : > { %v1376_v20 = vpack.c.bf16 %v3426_v19, %v3425_v17  ;;  %v1260_v21 = vpop.f32.mrb[19].mxu1  ;;  %3455 = vmatprep.subr.bf16.mxu0 %v4145_v8 }
 0x1f4   : > { %v1375_v22 = vpack.c.bf16 %v1260_v21, %v1257_v18  ;;  %v3877_v21 = vld [vmem:[%s4471_s15 + $0x50] sm:$0xff]  }
 0x1f6   : > { %3456 = vmatpush3.bf16.msra.mxu0 %v1375_v22 }
 0x1f7   : > { %3457 = vmatprep.subr.bf16.mxu0 %v4145_v8 }
 0x1fa   : > { %3458 = vmatpush3.bf16.msra.mxu0 %v1376_v20 }
 0x1fb   : > { %3463 = vmatprep.subr.bf16.mxu0 %v4668_v11 }
 0x1fd   : > { %3460 = vmatmul.mubr.bf16.vlgmr.msra.gmra.mrb[0].mxu0 %v1368_v49 }
 0x1fe   : > { %3465 = vmatprep.mubr.bf16.mxu0 %v4713_v23 }
 0x203   : > { %3464 = vmatpush3.bf16.xpose.msra.mxu0 %v4668_v11 }
 0x204   : > { %2009 = vmatprep.subr.bf16.mxu0 %v4488_v33  ;;  %v4743_v33 = vld [vmem:[#allocation9 + $0x28] sm:$0xff]  }
 0x20a   : > { %3466 = vmatmul.mubr.bf16.vlgmr.msra.gmra.mrb[4].mxu0 %v4725_v26 }
 0x20b   : > { %2010 = vmatpush1.bf16.msra.mxu0 %v4490_v34  ;;  %3469 = vmatprep.mubr.bf16.mxu0 %v4727_v27  ;;  %v3429_v34 = vpop.f32.mrb[20].mxu1 }
 0x20c   : > { %2011 = vmatprep.subr.bf16.mxu0 %v4493_v35  ;;  %v4746_v35 = vld [vmem:[#allocation9 + $0x30] sm:$0xff]   ;;  %v1273_v49 = vpop.f32.mrb[21].mxu1 }
 0x20d   : > { %v3430_v11 = vpop.f32.mrb[22].mxu1 }
 0x20f   : > { %2012 = vmatpush1.bf16.msra.mxu0 %v4496_v36  ;;  %v4748_v36 = vpop.permute.xlu0 %699 }
 0x210   : > { %2013 = vmatprep.subr.bf16.mxu0 %v4499_v37  ;;  %v1336_v37 = vadd.f32 %v1273_v49, %v4748_v36 }
 0x212   : > { %3470 = vmatmul.mubr.bf16.gmra.mrb[8].mxu0 %v4733_v28 }
 0x213   : > { %2014 = vmatpush1.bf16.msra.mxu0 %v4502_v38  ;;  %3473 = vmatprep.mubr.bf16.mxu0 %v4736_v31  ;;  %v1276_v38 = vpop.f32.mrb[23].mxu1 }
 0x214   : > { %2015 = vmatprep.subr.bf16.mxu0 %v4505_v39  ;;  %v4755_v39 = vpop.permute.xlu0 %704  ;;  %v3433_v50 = vpop.f32.mrb[24].mxu1 }
 0x215   : > { %v1337_v29 = vadd.f32 %v1276_v38, %v4755_v39 }
 0x217   : > { %2016 = vmatpush1.bf16.msra.mxu0 %v4508_v40  ;;  %v1352_v40 = vmax.f32 %v1336_v37, 0.0 }
 0x218   : > { %2017 = vmatprep.subr.bf16.mxu0 %v4511_v41  ;;  %v1353_v41 = vmax.f32 %v1337_v29, 0.0  ;;  %v4764_v53 = vpop.permute.xlu0 %719 }
 0x21a   : > { %3474 = vmatmul.mubr.bf16.gmra.mrb[12].mxu0 %v4743_v33  ;;  %v1596_v54 = vpack.c.bf16 %v1353_v41, %v1352_v40  ;;  %v3878_v40 = vld [vmem:[%s4471_s15 + $0x58] sm:$0xff]  }
 0x21b   : > { %2018 = vmatpush1.bf16.msra.mxu0 %v4514_v42  ;;  %3477 = vmatprep.mubr.bf16.mxu0 %v4746_v35  ;;  %v1338_v42 = vadd.f32 %v3429_v34, %v4762_v52 }
 0x21c   : > { %2019 = vmatprep.subr.bf16.mxu0 %v4517_v43  ;;  %v1289_v43 = vpop.f32.mrb[25].mxu1  ;;  %3481 = vmatprep.subr.bf16.mxu1 %v1596_v54  ;;  %v4773_v57 = vpop.permute.xlu0 %729 }
 0x21d   : > { %v3434_v55 = vpop.f32.mrb[26].mxu1  ;;  %v1354_v58 = vmax.f32 %v1338_v42, 0.0  ;;  %v1340_v13 = vadd.f32 %v1289_v43, %v4764_v53  ;;  %3482 = vmatpush3.bf16.msra.mxu1 %v1596_v54 }
 0x21e   : > { %v1292_v56 = vpop.f32.mrb[27].mxu1 }
 0x21f   : > { %2020 = vmatpush1.bf16.msra.mxu0 %v4520_v44  ;;  %v4771_v44 = vpop.permute.xlu1 %714  ;;  %v1356_v17 = vmax.f32 %v1340_v13, 0.0 }
 0x220   : > { %2021 = vmatprep.subr.bf16.mxu0 %v4523_v45  ;;  %v3875_v45 = vld [vmem:[%s4471_s15 + $0x40] sm:$0xff]   ;;  %v1339_v12 = vadd.f32 %v3430_v11, %v4771_v44 }
 0x222   : > { %3478 = vmatmul.mubr.bf16.gmra.mrb[16].mxu0 %v4759_v30  ;;  %v1355_v15 = vmax.f32 %v1339_v12, 0.0 }
 0x223   : > { %2022 = vmatpush1.bf16.msra.mxu0 %v4526_v46  ;;  %2041 = vmatprep.mubr.bf16.mxu0 %v4144_v32  ;;  %v4780_v46 = vpop.permute.xlu1 %724  ;;  %v4782_v32 = vpop.permute.xlu0 %739 }
 0x224   : > { %2023 = vmatprep.subr.bf16.mxu0 %v4529_v47  ;;  %v1342_v47 = vadd.f32 %v3433_v50, %v4773_v57  ;;  %v1341_v18 = vadd.f32 %v1292_v56, %v4780_v46  ;;  %v1597_v19 = vpack.c.bf16 %v1355_v15, %v1354_v58  ;;  %v3879_v56 = vld [vmem:[%s4471_s15 + $0x60] sm:$0xff]  }
 0x226   : > { %v1357_v20 = vmax.f32 %v1341_v18, 0.0  ;;  %3483 = vmatprep.subr.bf16.mxu1 %v1597_v19  ;;  %v1358_v22 = vmax.f32 %v1342_v47, 0.0 }
 0x227   : > { %2024 = vmatpush1.bf16.msra.mxu0 %v4531_v48  ;;  %v4788_v48 = vpop.permute.xlu1 %734  ;;  %v4792_v49 = vpop.permute.xlu0 %749  ;;  %3484 = vmatpush3.bf16.msra.mxu1 %v1597_v19 }
 0x228   : > { %3531 = vmatprep.subr.bf16.mxu0 %v3875_v45  ;;  %v1343_v34 = vadd.f32 %v3434_v55, %v4788_v48  ;;  %v1598_v37 = vpack.c.bf16 %v1357_v20, %v1356_v17  ;;  %v3880_v17 = vld [vmem:[%s4471_s15 + $0x68] sm:$0xff]  }
 0x22a   : > { %2042 = vmatmul.mubr.bf16.vlgmr.msra.gmra.mrb[20].mxu0 %v3874_v14  ;;  %v1359_v11 = vmax.f32 %v1343_v34, 0.0  ;;  %3485 = vmatprep.subr.bf16.mxu1 %v1598_v37 }
 0x22b   : > { %3532 = vmatpush3.bf16.msra.mxu0 %v3875_v45  ;;  %3547 = vmatprep.mubr.bf16.mxu0 %v4536_v51  ;;  %v4794_v38 = vpop.permute.xlu1 %744  ;;  %v3437_v51 = vpop.f32.mrb[28].mxu1 }
 0x22c   : > { %3533 = vmatprep.subr.bf16.mxu0 %v3876_v16  ;;  %3486 = vmatpush3.bf16.msra.mxu1 %v1598_v37  ;;  %v1599_v29 = vpack.c.bf16 %v1359_v11, %v1358_v22  ;;  %v1346_v41 = vadd.f32 %v3437_v51, %v4792_v49  ;;  %v1305_v50 = vpop.f32.mrb[29].mxu1  ;;  %v4798_v42 = vpop.permute.xlu0 %759  ;;  %v3881_v51 = vld [vmem:[%s4471_s15 + $0x70] sm:$0xff]  }
 0x22d   : > { %v1344_v54 = vadd.f32 %v1305_v50, %v4782_v32  ;;  %v3438_v43 = vpop.f32.mrb[30].mxu1 }
 0x22e   : > { %3487 = vmatprep.subr.bf16.mxu1 %v1599_v29  ;;  %v1362_v45 = vmax.f32 %v1346_v41, 0.0  ;;  %v1308_v12 = vpop.f32.mrb[31].mxu1 }
 0x22f   : > { %3534 = vmatpush3.bf16.msra.mxu0 %v3876_v16  ;;  %v4801_v55 = vpop.permute.xlu1 %754  ;;  %v1360_v13 = vmax.f32 %v1344_v54, 0.0  ;;  %v1345_v14 = vadd.f32 %v1308_v12, %v4794_v38  ;;  %v3441_v19 = vpop.f32.mrb[32].mxu1 }
 0x230   : > { %3535 = vmatprep.subr.bf16.mxu0 %v3877_v21  ;;  %v1347_v58 = vadd.f32 %v3438_v43, %v4801_v55  ;;  %3488 = vmatpush3.bf16.msra.mxu1 %v1599_v29  ;;  %v4809_v18 = vpop.permute.xlu0 %769  ;;  %v1321_v34 = vpop.f32.mrb[33].mxu1 }
 0x231   : > { %v1361_v16 = vmax.f32 %v1345_v14, 0.0  ;;  %v1350_v22 = vadd.f32 %v3441_v19, %v4809_v18  ;;  %v1348_v37 = vadd.f32 %v1321_v34, %v4798_v42  ;;  %v3442_v11 = vpop.f32.mrb[34].mxu1  ;;  %v4819_v14 = vld [vmem:[#allocation11 + $0x8] sm:$0xff]  }
 0x232   : > { %v1363_v15 = vmax.f32 %v1347_v58, 0.0  ;;  %v1324_v50 = vpop.f32.mrb[35].mxu1  ;;  %v4834_v19 = vld [vmem:[#allocation11 + $0x28] sm:$0xff]  }
 0x233   : > { %3536 = vmatpush3.bf16.msra.mxu0 %v3877_v21  ;;  %v4806_v47 = vpop.permute.xlu1 %764  ;;  %v1600_v21 = vpack.c.bf16 %v1361_v16, %v1360_v13  ;;  %v1366_v29 = vmax.f32 %v1350_v22, 0.0  ;;  %v1364_v54 = vmax.f32 %v1348_v37, 0.0  ;;  %v4827_v16 = vld [vmem:[#allocation11 + $0x18] sm:$0xff]  }
 0x234   : > { %3537 = vmatprep.subr.bf16.mxu0 %v3878_v40  ;;  %v1601_v20 = vpack.c.bf16 %v1363_v15, %v1362_v45  ;;  %v1349_v43 = vadd.f32 %v1324_v50, %v4806_v47  ;;  %v4824_v15 = vld [vmem:[#allocation11 + $0x10] sm:$0xff]  }
 0x235   : > { %3489 = vmatprep.subr.bf16.mxu1 %v1600_v21 }
 0x236   : > { %3490 = vmatpush3.bf16.msra.mxu1 %v1600_v21  ;;  %v1365_v58 = vmax.f32 %v1349_v43, 0.0 }
 0x237   : > { %3538 = vmatpush3.bf16.msra.mxu0 %v3878_v40  ;;  %v4813_v40 = vpop.permute.xlu1 %774  ;;  %3491 = vmatprep.subr.bf16.mxu1 %v1601_v20 }
 0x238   : > { %3539 = vmatprep.subr.bf16.mxu0 %v3879_v56  ;;  %v1351_v41 = vadd.f32 %v3442_v11, %v4813_v40  ;;  %v1602_v13 = vpack.c.bf16 %v1365_v58, %v1364_v54 }
 0x23a   : > { %v1367_v45 = vmax.f32 %v1351_v41, 0.0  ;;  %3492 = vmatpush3.bf16.msra.mxu1 %v1601_v20 }
 0x23b   : > { %3540 = vmatpush3.bf16.msra.mxu0 %v3879_v56  ;;  %v3882_v56 = vld [vmem:[%s4471_s15 + $0x78] sm:$0xff]   ;;  %3493 = vmatprep.subr.bf16.mxu1 %v1602_v13  ;;  %s4945_s15 = scalar_lea.vmem [#allocation12], %s4468_s20  ;;  %s5113_s20 = sld [smem:[#allocation18_spill]] }
 0x23c   : > { %3541 = vmatprep.subr.bf16.mxu0 %v3880_v17  ;;  %v1603_v12 = vpack.c.bf16 %v1367_v45, %v1366_v29  ;;  %s2832_s29 = sshll.u32 %s4945_s15, 4  ;;  %s5016_s29 = int_to_ptr.vmem [resolvable:$true] %s2832_s29 }
 0x23d   : > { %s4043_s16 = scalar_lea.vmem %s5016_s29, 2048  ;;  %p4050_p6 = scmp.lt.s32.totalorder %s5016_s29, %s4048_s2 }
 0x23e   : > { %3494 = vmatpush3.bf16.msra.mxu1 %v1602_v13  ;;  %p4044_p11 = scmp.ne.s32.totalorder %s5016_s29, %s4043_s16  ;;  %p4051_p7 = scmp.lt.s32.totalorder %s4049_s26, %s4043_s16 }
 0x23f   : > { %3542 = vmatpush3.bf16.msra.mxu0 %v3880_v17  ;;  %3495 = vmatprep.subr.bf16.mxu1 %v1603_v12  ;;  %v4832_v17 = vld [vmem:[#allocation11 + $0x20] sm:$0xff]  }
 0x240   : > { %3543 = vmatprep.subr.bf16.mxu0 %v3881_v51  ;;  %p4045_p13 = pnand %p4044_p11, %p5116_p12  ;;  %p4052_p8 = por %p4051_p7, %p4050_p6 }
 0x241   : > { %s3131_s25 = sshll.u32 %s5113_s20, 6 }
 0x242   : > { %3496 = vmatpush3.bf16.msra.mxu1 %v1603_v12  ;;  %s5014_s28 = scalar_lea.hbm %s5115_s21, %s3131_s25  ;;  %p4046_p2 = pneg %p4045_p13 }
 0x243   : > { %3544 = vmatpush3.bf16.msra.mxu0 %v3881_v51 }
 0x244   : > { %3545 = vmatprep.subr.bf16.mxu0 %v3882_v56  ;;  %p4053_p9 = pnand %p4052_p8, %p4046_p2 }
 0x245   : > { %3498 = vmatmul.mubr.bf16.vlgmr.msra.gmra.mrb[36].mxu1 %v4819_v14 }
 0x246   : > { %3501 = vmatprep.mubr.bf16.mxu1 %v4824_v15 }
 0x247   : > { %3546 = vmatpush3.bf16.msra.mxu0 %v3882_v56 }
 0x24a   : > { %3548 = vmatmul.mubr.bf16.vlgmr.msra.gmra.mrb[24].mxu0 %v4547_v59  ;;  %v4840_v59 = vld [vmem:[#allocation11 + $0x30] sm:$0xff]  }
 0x24b   : > { %3551 = vmatprep.mubr.bf16.mxu0 %v4549_v60  ;;  %v4842_v60 = vld [vmem:[#allocation11 + $0x38] sm:$0xff]  }
 0x24d   : > { %3502 = vmatmul.mubr.bf16.gmra.mrb[40].mxu1 %v4827_v16 }
 0x24e   : > { %3505 = vmatprep.mubr.bf16.mxu1 %v4832_v17 }
 0x252   : > { %3552 = vmatmul.mubr.bf16.gmra.mrb[28].mxu0 %v4553_v61 }
 0x253   : > { %3555 = vmatprep.mubr.bf16.mxu0 %v4555_v62 }
 0x255   : > { %3506 = vmatmul.mubr.bf16.gmra.mrb[44].mxu1 %v4834_v19 }
 0x256   : > { %3509 = vmatprep.mubr.bf16.mxu1 %v4840_v59 }
 0x25a   : > { %3556 = vmatmul.mubr.bf16.gmra.mrb[32].mxu0 %v4559_v63 }
 0x25b   : > { %3559 = vmatprep.mubr.bf16.mxu0 %v4561_v0 }
 0x25d   : > { %3510 = vmatmul.mubr.bf16.gmra.mrb[48].mxu1 %v4842_v60 }
 0x262   : > { %3560 = vmatmul.mubr.bf16.gmra.mrb[36].mxu0 %v4565_v1 }
 0x263   : > { %3563 = vmatprep.mubr.bf16.mxu0 %v4568_v2 }
 0x26a   : > { %3564 = vmatmul.mubr.bf16.gmra.mrb[40].mxu0 %v4570_v3 }
 0x26b   : > { %3567 = vmatprep.mubr.bf16.mxu0 %v4572_v4 }
 0x272   : > { %3568 = vmatmul.mubr.bf16.gmra.mrb[44].mxu0 %v4577_v5 }
 0x273   : > { %3571 = vmatprep.mubr.bf16.mxu0 %v4580_v6 }
 0x27a   : > { %3572 = vmatmul.mubr.bf16.gmra.mrb[48].mxu0 %v4582_v7 }
 0x27b   : > { %3575 = vmatprep.mubr.bf16.mxu0 %v4587_v9 }
 0x282   : > { %3576 = vmatmul.mubr.bf16.gmra.mrb[52].mxu0 %v4589_v10 }
 0x283   : > { %3633 = vmatprep.mubr.bf16.mxu0 %v4720_v24 }
 0x2d0   : > { %v1411_v61 = vpop.f32.mrb[0].mxu0 }
 0x2d1   : > { %v3461_v62 = vpop.f32.mrb[1].mxu0 }
 0x2d2   : > { %v1414_v63 = vpop.f32.mrb[2].mxu0 }
 0x2d3   : > { %v1418_v0 = vmax.f32 %v1411_v61, %v1414_v63  ;;  %v3462_v1 = vpop.f32.mrb[3].mxu0 }
 0x2d5   : > { %v1419_v2 = vrot.slane %v1418_v0, 4 }
 0x2d7   : > { %v1420_v3 = vmax.f32 %v1418_v0, %v1419_v2 }
 0x2d9   : > { %v1421_v4 = vrot.slane %v1420_v3, 2 }
 0x2db   : > { %v1422_v20 = vmax.f32 %v1420_v3, %v1421_v4 }
 0x2dd   : > { %v1423_v5 = vrot.slane %v1422_v20, 1  ;;  %v3467_v21 = vpop.f32.mrb[4].mxu0 }
 0x2de   : > { %v1524_v6 = vpop.f32.mrb[5].mxu0 }
 0x2df   : > { %v1424_v22 = vmax.f32 %v1422_v20, %v1423_v5  ;;  %v3468_v7 = vpop.f32.mrb[6].mxu0 }
 0x2e0   : > { %v1588_v34 = vpack.c.bf16 %v3468_v7, %v3467_v21  ;;  %v1527_v9 = vpop.f32.mrb[7].mxu0 }
 0x2e1   : > { %v1425_v10 = vsub.f32 %v1411_v61, %v1424_v22  ;;  %v1426_v37 = vsub.f32 %v1414_v63, %v1424_v22  ;;  %v1587_v24 = vpack.c.bf16 %v1527_v9, %v1524_v6 }
 0x2e3   : > { %v1427_v11 = vmul.f32 1.442695, %v1425_v10  ;;  %v1429_v51 = vmul.f32 1.442695, %v1426_v37  ;;  %3515 = vmatprep.mubr.msk.bf16.mxu1 %vm1749_vm1, %v1587_v24 }
 0x2e5   : > { %3891 = vpow2.f32 %v1427_v11  ;;  %v3471_v29 = vpop.f32.mrb[8].mxu0 }
 0x2e6   : > { %3893 = vpow2.f32 %v1429_v51  ;;  %v1540_v41 = vpop.f32.mrb[9].mxu0 }
 0x2e7   : > { %v3472_v50 = vpop.f32.mrb[10].mxu0 }
 0x2e8   : > { %v1590_v54 = vpack.c.bf16 %v3472_v50, %v3471_v29  ;;  %v1543_v43 = vpop.f32.mrb[11].mxu0 }
 0x2e9   : > { %v1589_v45 = vpack.c.bf16 %v1543_v43, %v1540_v41 }
 0x2ed   : > { %v3475_v58 = vpop.f32.mrb[12].mxu0 }
 0x2ee   : > { %v1556_v56 = vpop.f32.mrb[13].mxu0 }
 0x2ef   : > { %v3892_v12 = vpop.eup %3891  ;;  %v3476_v13 = vpop.f32.mrb[14].mxu0 }
 0x2f0   : > { %v3894_v62 = vpop.eup %3893  ;;  %v1592_v61 = vpack.c.bf16 %v3476_v13, %v3475_v58  ;;  %v1559_v63 = vpop.f32.mrb[15].mxu0 }
 0x2f1   : > { %v1431_v0 = vadd.f32 %v3894_v62, %v3892_v12  ;;  %v1591_v1 = vpack.c.bf16 %v1559_v63, %v1556_v56 }
 0x2f3   : > { %v1432_v2 = vrot.slane %v1431_v0, 4 }
 0x2f5   : > { %v1433_v3 = vadd.f32 %v1432_v2, %v1431_v0  ;;  %v3479_v4 = vpop.f32.mrb[16].mxu0 }
 0x2f6   : > { %v1572_v20 = vpop.f32.mrb[17].mxu0 }
 0x2f7   : > { %v1434_v5 = vrot.slane %v1433_v3, 2  ;;  %v3480_v21 = vpop.f32.mrb[18].mxu0 }
 0x2f8   : > { %v1594_v6 = vpack.c.bf16 %v3480_v21, %v3479_v4  ;;  %v1575_v22 = vpop.f32.mrb[19].mxu0 }
 0x2f9   : > { %v1435_v7 = vadd.f32 %v1434_v5, %v1433_v3  ;;  %v1593_v9 = vpack.c.bf16 %v1575_v22, %v1572_v20 }
 0x2fb   : > { %v1436_v10 = vrot.slane %v1435_v7, 1 }
 0x2fd   : > { %v4857_v37 = vpop.f32.mrb[20].mxu0  ;;  %v1437_v24 = vadd.f32 %v1436_v10, %v1435_v7 }
 0x2fe   : > { %v2045_v11 = vpop.f32.mrb[21].mxu0 }
 0x2ff   : > { %v2052_v51 = vadd.f32 %v4640_v25, %v2045_v11  ;;  %v4860_v29 = vpop.f32.mrb[22].mxu0  ;;  %3895 = vrcp.f32 %v1437_v24 }
 0x300   : > { %v2297_v41 = vpack.c.bf16 %v4860_v29, %v4857_v37  ;;  %v2049_v50 = vpop.f32.mrb[23].mxu0 }
 0x301   : > { %v2053_v43 = vadd.f32 %v4640_v25, %v2049_v50  ;;  %v2054_v58 = vmax.f32 %v2052_v51, 0.0 }
 0x303   : > { %v2055_v56 = vmax.f32 %v2053_v43, 0.0 }
 0x305   : > { %v4865_v13 = vpack.c.bf16 %v2055_v56, %v2054_v58 }
 0x309   : > { %v3896_v63 = vpop.eup %3895 }
 0x30a   : > { %v1439_v0 = vmul.f32 %v3896_v63, %v3892_v12  ;;  %v1440_v2 = vmul.f32 %v3896_v63, %v3894_v62 }
 0x30c   : > { %v1595_v3 = vpack.c.bf16 %v1440_v2, %v1439_v0 }
 0x30e   : > { %3513 = vmatprep.subr.bf16.mxu1 %v1595_v3 }
 0x30f   : > { %3514 = vmatpush3.bf16.msra.mxu1 %v1595_v3 }
 0x310   : > { %3579 = vmatprep.subr.bf16.mxu1 %v4145_v8 }
 0x312   : > { %3516 = vmatmul.mubr.msk.bf16.vlgmr.msra.gmra.mrb[36].mxu1 %vm1749_vm1, %v1588_v34 }
 0x313   : > { %3519 = vmatprep.mubr.msk.bf16.mxu1 %vm1749_vm1, %v1589_v45 }
 0x31a   : > { %3520 = vmatmul.mubr.msk.bf16.gmra.mrb[40].mxu1 %vm1749_vm1, %v1590_v54 }
 0x31b   : > { %3523 = vmatprep.mubr.msk.bf16.mxu1 %vm1749_vm1, %v1591_v1 }
 0x31d   : > { %v3549_v25 = vpop.f32.mrb[24].mxu0 }
 0x31e   : > { %v2138_v4 = vpop.f32.mrb[25].mxu0 }
 0x31f   : > { %v3550_v20 = vpop.f32.mrb[26].mxu0 }
 0x320   : > { %v2299_v5 = vpack.c.bf16 %v3550_v20, %v3549_v25  ;;  %v2141_v21 = vpop.f32.mrb[27].mxu0 }
 0x321   : > { %v2298_v12 = vpack.c.bf16 %v2141_v21, %v2138_v4 }
 0x322   : > { %3524 = vmatmul.mubr.msk.bf16.gmra.mrb[44].mxu1 %vm1749_vm1, %v1592_v61 }
 0x323   : > { %3527 = vmatprep.mubr.msk.bf16.mxu1 %vm1749_vm1, %v1593_v9  ;;  %3580 = vmatpush3.bf16.msra.mxu1 %v2298_v12 }
 0x324   : > { %3581 = vmatprep.subr.bf16.mxu1 %v4145_v8 }
 0x325   : > { %v3553_v34 = vpop.f32.mrb[28].mxu0 }
 0x326   : > { %v2154_v62 = vpop.f32.mrb[29].mxu0 }
 0x327   : > { %v3554_v45 = vpop.f32.mrb[30].mxu0  ;;  %3582 = vmatpush3.bf16.msra.mxu1 %v2299_v5 }
 0x328   : > { %v2301_v54 = vpack.c.bf16 %v3554_v45, %v3553_v34  ;;  %v2157_v22 = vpop.f32.mrb[31].mxu0  ;;  %3583 = vmatprep.subr.bf16.mxu1 %v4145_v8 }
 0x329   : > { %v2300_v1 = vpack.c.bf16 %v2157_v22, %v2154_v62 }
 0x32a   : > { %3528 = vmatmul.mubr.msk.bf16.gmra.mrb[48].mxu1 %vm1749_vm1, %v1594_v6 }
 0x32b   : > { %3584 = vmatpush3.bf16.msra.mxu1 %v2300_v1  ;;  %3595 = vmatprep.mubr.msk.bf16.mxu1 %vm4146_vm0, %v4145_v8 }
 0x32c   : > { %3585 = vmatprep.subr.bf16.mxu1 %v4145_v8 }
 0x32d   : > { %v3557_v61 = vpop.f32.mrb[32].mxu0 }
 0x32e   : > { %v2170_v7 = vpop.f32.mrb[33].mxu0 }
 0x32f   : > { %v3558_v9 = vpop.f32.mrb[34].mxu0  ;;  %3586 = vmatpush3.bf16.msra.mxu1 %v2301_v54 }
 0x330   : > { %v2303_v10 = vpack.c.bf16 %v3558_v9, %v3557_v61  ;;  %v2173_v24 = vpop.f32.mrb[35].mxu0  ;;  %3587 = vmatprep.subr.bf16.mxu1 %v4145_v8 }
 0x331   : > { %v2302_v11 = vpack.c.bf16 %v2173_v24, %v2170_v7 }
 0x333   : > { %3588 = vmatpush3.bf16.msra.mxu1 %v2302_v11 }
 0x334   : > { %3589 = vmatprep.subr.bf16.mxu1 %v4145_v8 }
 0x335   : > { %v3561_v51 = vpop.f32.mrb[36].mxu0 }
 0x336   : > { %v2186_v6 = vpop.f32.mrb[37].mxu0 }
 0x337   : > { %v3562_v50 = vpop.f32.mrb[38].mxu0  ;;  %3590 = vmatpush3.bf16.msra.mxu1 %v2303_v10 }
 0x338   : > { %v2305_v43 = vpack.c.bf16 %v3562_v50, %v3561_v51  ;;  %v2189_v58 = vpop.f32.mrb[39].mxu0  ;;  %3591 = vmatprep.subr.bf16.mxu1 %v4145_v8 }
 0x339   : > { %v2304_v56 = vpack.c.bf16 %v2189_v58, %v2186_v6 }
 0x33b   : > { %3592 = vmatpush3.bf16.msra.mxu1 %v2304_v56 }
 0x33c   : > { %3593 = vmatprep.subr.bf16.mxu1 %v4145_v8 }
 0x33d   : > { %v3565_v63 = vpop.f32.mrb[40].mxu0 }
 0x33e   : > { %v2267_v0 = vadd.f32 %v3565_v63, %v4762_v52  ;;  %v2202_v2 = vpop.f32.mrb[41].mxu0 }
 0x33f   : > { %v2265_v3 = vadd.f32 %v2202_v2, %v4748_v36  ;;  %v3566_v25 = vpop.f32.mrb[42].mxu0  ;;  %3594 = vmatpush3.bf16.msra.mxu1 %v2305_v43 }
 0x340   : > { %v2268_v4 = vadd.f32 %v3566_v25, %v4771_v44  ;;  %v2205_v20 = vpop.f32.mrb[43].mxu0  ;;  %3599 = vmatprep.subr.bf16.mxu1 %v4865_v13  ;;  %v2283_v21 = vmax.f32 %v2267_v0, 0.0 }
 0x341   : > { %v2266_v5 = vadd.f32 %v2205_v20, %v4755_v39  ;;  %v2281_v8 = vmax.f32 %v2265_v3, 0.0 }
 0x342   : > { %v2284_v12 = vmax.f32 %v2268_v4, 0.0  ;;  %3596 = vmatmul.mubr.bf16.vlgmr.msra.gmra.mrb[52].mxu1 %v2297_v41 }
 0x343   : > { %v2282_v52 = vmax.f32 %v2266_v5, 0.0  ;;  %3601 = vmatprep.mubr.bf16.mxu1 %v4713_v23 }
 0x344   : > { %v2478_v36 = vpack.c.bf16 %v2284_v12, %v2283_v21 }
 0x345   : > { %v2477_v34 = vpack.c.bf16 %v2282_v52, %v2281_v8  ;;  %v3569_v62 = vpop.f32.mrb[44].mxu0 }
 0x346   : > { %v2271_v44 = vadd.f32 %v3569_v62, %v4773_v57  ;;  %v2218_v45 = vpop.f32.mrb[45].mxu0 }
 0x347   : > { %v2269_v54 = vadd.f32 %v2218_v45, %v4764_v53  ;;  %v3570_v22 = vpop.f32.mrb[46].mxu0  ;;  %3617 = vmatprep.subr.bf16.mxu0 %v2477_v34 }
 0x348   : > { %v2272_v39 = vadd.f32 %v3570_v22, %v4788_v48  ;;  %v2221_v1 = vpop.f32.mrb[47].mxu0  ;;  %3600 = vmatpush3.bf16.xpose.msra.mxu1 %v4865_v13  ;;  %3618 = vmatpush3.bf16.msra.mxu0 %v2477_v34  ;;  %v2287_v23 = vmax.f32 %v2271_v44, 0.0 }
 0x349   : > { %v2270_v37 = vadd.f32 %v2221_v1, %v4780_v46  ;;  %3619 = vmatprep.subr.bf16.mxu0 %v2478_v36  ;;  %v2285_v41 = vmax.f32 %v2269_v54, 0.0 }
 0x34a   : > { %v2288_v29 = vmax.f32 %v2272_v39, 0.0 }
 0x34b   : > { %v2286_v61 = vmax.f32 %v2270_v37, 0.0 }
 0x34c   : > { %v2480_v7 = vpack.c.bf16 %v2288_v29, %v2287_v23  ;;  %3620 = vmatpush3.bf16.msra.mxu0 %v2478_v36 }
 0x34d   : > { %v2479_v57 = vpack.c.bf16 %v2286_v61, %v2285_v41  ;;  %v3573_v9 = vpop.f32.mrb[48].mxu0 }
 0x34e   : > { %v2275_v53 = vadd.f32 %v3573_v9, %v4792_v49  ;;  %v2234_v10 = vpop.f32.mrb[49].mxu0 }
 0x34f   : > { %v2273_v48 = vadd.f32 %v2234_v10, %v4782_v32  ;;  %v3574_v24 = vpop.f32.mrb[50].mxu0  ;;  %3621 = vmatprep.subr.bf16.mxu0 %v2479_v57  ;;  %3602 = vmatmul.mubr.bf16.vlgmr.msra.gmra.mrb[56].mxu1 %v4725_v26 }
 0x350   : > { %v2276_v46 = vadd.f32 %v3574_v24, %v4801_v55  ;;  %v2237_v13 = vpop.f32.mrb[51].mxu0  ;;  %3622 = vmatpush3.bf16.msra.mxu0 %v2479_v57  ;;  %3605 = vmatprep.mubr.bf16.mxu1 %v4727_v27  ;;  %v2291_v51 = vmax.f32 %v2275_v53, 0.0 }
 0x351   : > { %v2274_v11 = vadd.f32 %v2237_v13, %v4794_v38  ;;  %3623 = vmatprep.subr.bf16.mxu0 %v2480_v7  ;;  %v2289_v50 = vmax.f32 %v2273_v48, 0.0 }
 0x352   : > { %v2292_v6 = vmax.f32 %v2276_v46, 0.0 }
 0x353   : > { %v2290_v49 = vmax.f32 %v2274_v11, 0.0 }
 0x354   : > { %v2482_v43 = vpack.c.bf16 %v2292_v6, %v2291_v51  ;;  %3624 = vmatpush3.bf16.msra.mxu0 %v2480_v7 }
 0x355   : > { %v2481_v32 = vpack.c.bf16 %v2290_v49, %v2289_v50  ;;  %v3577_v58 = vpop.f32.mrb[52].mxu0 }
 0x356   : > { %v2279_v56 = vadd.f32 %v3577_v58, %v4809_v18  ;;  %v2250_v26 = vpop.f32.mrb[53].mxu0 }
 0x357   : > { %v2277_v55 = vadd.f32 %v2250_v26, %v4798_v42  ;;  %v3578_v63 = vpop.f32.mrb[54].mxu0  ;;  %3625 = vmatprep.subr.bf16.mxu0 %v2481_v32  ;;  %3606 = vmatmul.mubr.bf16.gmra.mrb[60].mxu1 %v4733_v28  ;;  %v4920_v28 = vpop.permute.xlu0 %802 }
 0x358   : > { %v2280_v27 = vadd.f32 %v3578_v63, %v4813_v40  ;;  %v2253_v38 = vpop.f32.mrb[55].mxu0  ;;  %3626 = vmatpush3.bf16.msra.mxu0 %v2481_v32  ;;  %3609 = vmatprep.mubr.bf16.mxu1 %v4736_v31  ;;  %v2295_v2 = vmax.f32 %v2279_v56, 0.0  ;;  %v4922_v31 = vpop.permute.xlu1 %807 }
 0x359   : > { %v2278_v0 = vadd.f32 %v2253_v38, %v4806_v47  ;;  %3627 = vmatprep.subr.bf16.mxu0 %v2482_v43  ;;  %v2293_v25 = vmax.f32 %v2277_v55, 0.0 }
 0x35a   : > { %v2296_v3 = vmax.f32 %v2280_v27, 0.0 }
 0x35b   : > { %v2294_v18 = vmax.f32 %v2278_v0, 0.0 }
 0x35c   : > { %v2484_v4 = vpack.c.bf16 %v2296_v3, %v2295_v2  ;;  %3628 = vmatpush3.bf16.msra.mxu0 %v2482_v43 }
 0x35d   : > { %v2483_v42 = vpack.c.bf16 %v2294_v18, %v2293_v25 }
 0x35f   : > { %3629 = vmatprep.subr.bf16.mxu0 %v2483_v42  ;;  %3610 = vmatmul.mubr.bf16.gmra.mrb[64].mxu1 %v4743_v33  ;;  %v4924_v33 = vpop.permute.xlu0 %812 }
 0x360   : > { %3630 = vmatpush3.bf16.msra.mxu0 %v2483_v42  ;;  %3613 = vmatprep.mubr.bf16.mxu1 %v4746_v35  ;;  %v4926_v35 = vpop.permute.xlu1 %817 }
 0x361   : > { %3631 = vmatprep.subr.bf16.mxu0 %v2484_v4 }
 0x364   : > { %3632 = vmatpush3.bf16.msra.mxu0 %v2484_v4  ;;  %v4930_v47 = vpop.permute.xlu1 %827 }
 0x367   : > { %3614 = vmatmul.mubr.bf16.gmra.mrb[68].mxu1 %v4759_v30  ;;  %3634 = vmatmul.mubr.bf16.vlgmr.msra.gmra.mrb[56].mxu0 %v4819_v14  ;;  %v4928_v30 = vpop.permute.xlu0 %822 }
 0x368   : > { %3637 = vmatprep.mubr.bf16.mxu0 %v4824_v15 }
 0x36b   : > { %v4932_v40 = vpop.permute.xlu0 %832 }
 0x36f   : > { %3638 = vmatmul.mubr.bf16.gmra.mrb[60].mxu0 %v4827_v16  ;;  %v4940_v8 = vpop.permute.xlu0 %842 }
 0x370   : > { %3641 = vmatprep.mubr.bf16.mxu0 %v4832_v17  ;;  %v4935_v17 = vpop.permute.xlu1 %837 }
 0x373   : > { %v4952_v29 = vpop.permute.xlu0 %852 }
 0x374   : > { %v4942_v62 = vpop.permute.xlu1 %847 }
 0x377   : > { %3642 = vmatmul.mubr.bf16.gmra.mrb[64].mxu0 %v4834_v19  ;;  %v4959_v11 = vpop.permute.xlu0 %862 }
 0x378   : > { %3645 = vmatprep.mubr.bf16.mxu0 %v4840_v59  ;;  %v4955_v57 = vpop.permute.xlu1 %857 }
 0x37b   : > { %v4967_v27 = vpop.permute.xlu0 %872 }
 0x37c   : > { %v4964_v43 = vpop.permute.xlu1 %867 }
 0x37f   : > { %3646 = vmatmul.mubr.bf16.gmra.mrb[68].mxu0 %v4842_v60 }
 0x380   : > { %v4971_v25 = vpop.permute.xlu1 %877 }
 0x3e5   : > { %v3517_v14 = vpop.f32.mrb[36].mxu1 }
 0x3e6   : > { %v1873_v15 = vadd.f32 %v3517_v14, %v4924_v33  ;;  %v1808_v16 = vpop.f32.mrb[37].mxu1 }
 0x3e7   : > { %v1871_v19 = vadd.f32 %v1808_v16, %v4920_v28  ;;  %v3518_v59 = vpop.f32.mrb[38].mxu1 }
 0x3e8   : > { %v1874_v60 = vadd.f32 %v3518_v59, %v4926_v35  ;;  %v1811_v20 = vpop.f32.mrb[39].mxu1  ;;  %v1889_v21 = vmax.f32 %v1873_v15, 0.0 }
 0x3e9   : > { %v1872_v5 = vadd.f32 %v1811_v20, %v4922_v31  ;;  %v1887_v52 = vmax.f32 %v1871_v19, 0.0 }
 0x3ea   : > { %v1890_v12 = vmax.f32 %v1874_v60, 0.0 }
 0x3eb   : > { %v1888_v36 = vmax.f32 %v1872_v5, 0.0 }
 0x3ec   : > { %v3174_v34 = vpack.c.bf16 %v1890_v12, %v1889_v21 }
 0x3ed   : > { %v3169_v44 = vpack.c.bf16 %v1888_v36, %v1887_v52  ;;  %v3521_v45 = vpop.f32.mrb[40].mxu1 }
 0x3ee   : > { %3246 = vst [vmem:[%s4945_s15 + $0x8] sm:$0xff] %v3174_v34   ;;  %v1877_v54 = vadd.f32 %v3521_v45, %v4932_v40  ;;  %v1824_v22 = vpop.f32.mrb[41].mxu1 }
 0x3ef   : > { %3170 = vst [vmem:[%s4945_s15] sm:$0xff] %v3169_v44   ;;  %v1875_v39 = vadd.f32 %v1824_v22, %v4928_v30  ;;  %v3522_v1 = vpop.f32.mrb[42].mxu1 }
 0x3f0   : > { %v1878_v37 = vadd.f32 %v3522_v1, %v4935_v17  ;;  %v1827_v23 = vpop.f32.mrb[43].mxu1  ;;  %v1893_v61 = vmax.f32 %v1877_v54, 0.0 }
 0x3f1   : > { %v1876_v41 = vadd.f32 %v1827_v23, %v4930_v47  ;;  %v1891_v9 = vmax.f32 %v1875_v39, 0.0 }
 0x3f2   : > { %v1894_v7 = vmax.f32 %v1878_v37, 0.0 }
 0x3f3   : > { %v1892_v53 = vmax.f32 %v1876_v41, 0.0 }
 0x3f4   : > { %v3184_v10 = vpack.c.bf16 %v1894_v7, %v1893_v61 }
 0x3f5   : > { %v3179_v48 = vpack.c.bf16 %v1892_v53, %v1891_v9  ;;  %v3525_v24 = vpop.f32.mrb[44].mxu1 }
 0x3f6   : > { %3248 = vst [vmem:[%s4945_s15 + $0x18] sm:$0xff] %v3184_v10   ;;  %v1881_v46 = vadd.f32 %v3525_v24, %v4952_v29  ;;  %v1840_v13 = vpop.f32.mrb[45].mxu1 }
 0x3f7   : > { %3247 = vst [vmem:[%s4945_s15 + $0x10] sm:$0xff] %v3179_v48   ;;  %v1879_v51 = vadd.f32 %v1840_v13, %v4940_v8  ;;  %v3526_v6 = vpop.f32.mrb[46].mxu1 }
 0x3f8   : > { %v1882_v50 = vadd.f32 %v3526_v6, %v4955_v57  ;;  %v1843_v49 = vpop.f32.mrb[47].mxu1  ;;  %v1897_v58 = vmax.f32 %v1881_v46, 0.0 }
 0x3f9   : > { %v1880_v32 = vadd.f32 %v1843_v49, %v4942_v62  ;;  %v1895_v26 = vmax.f32 %v1879_v51, 0.0 }
 0x3fa   : > { %v1898_v56 = vmax.f32 %v1882_v50, 0.0 }
 0x3fb   : > { %v1896_v55 = vmax.f32 %v1880_v32, 0.0 }
 0x3fc   : > { %v3194_v63 = vpack.c.bf16 %v1898_v56, %v1897_v58 }
 0x3fd   : > { %v3189_v38 = vpack.c.bf16 %v1896_v55, %v1895_v26  ;;  %v3529_v0 = vpop.f32.mrb[48].mxu1 }
 0x3fe   : > { %3250 = vst [vmem:[%s4945_s15 + $0x28] sm:$0xff] %v3194_v63   ;;  %v1885_v2 = vadd.f32 %v3529_v0, %v4967_v27  ;;  %v1856_v3 = vpop.f32.mrb[49].mxu1 }
 0x3ff   : > { %3249 = vst [vmem:[%s4945_s15 + $0x20] sm:$0xff] %v3189_v38   ;;  %v1883_v18 = vadd.f32 %v1856_v3, %v4959_v11  ;;  %v3530_v4 = vpop.f32.mrb[50].mxu1 }
 0x400   : > { %v1886_v42 = vadd.f32 %v3530_v4, %v4971_v25  ;;  %v1859_v14 = vpop.f32.mrb[51].mxu1  ;;  %v1901_v16 = vmax.f32 %v1885_v2, 0.0 }
 0x401   : > { %v1884_v15 = vadd.f32 %v1859_v14, %v4964_v43  ;;  %v1899_v59 = vmax.f32 %v1883_v18, 0.0 }
 0x402   : > { %v1902_v19 = vmax.f32 %v1886_v42, 0.0 }
 0x403   : > { %v1900_v60 = vmax.f32 %v1884_v15, 0.0 }
 0x404   : > { %v3204_v20 = vpack.c.bf16 %v1902_v19, %v1901_v16 }
 0x405   : > { %v3199_v5 = vpack.c.bf16 %v1900_v60, %v1899_v59 }
 0x406   : > { %3252 = vst [vmem:[%s4945_s15 + $0x38] sm:$0xff] %v3204_v20  }
 0x407   : > { %3251 = vst [vmem:[%s4945_s15 + $0x30] sm:$0xff] %v3199_v5  }
 0x415   : > { %v2340_v21 = vpop.f32.mrb[52].mxu1 }
 0x416   : > { %v3597_v12 = vpop.f32.mrb[53].mxu1 }
 0x417   : > { %v2343_v52 = vpop.f32.mrb[54].mxu1 }
 0x418   : > { %v2347_v36 = vmax.f32 %v2340_v21, %v2343_v52  ;;  %v3598_v34 = vpop.f32.mrb[55].mxu1 }
 0x41a   : > { %v2348_v44 = vrot.slane %v2347_v36, 4 }
 0x41c   : > { %v2349_v45 = vmax.f32 %v2347_v36, %v2348_v44 }
 0x41e   : > { %v2350_v54 = vrot.slane %v2349_v45, 2 }
 0x420   : > { %v2351_v22 = vmax.f32 %v2349_v45, %v2350_v54 }
 0x422   : > { %v2352_v39 = vrot.slane %v2351_v22, 1  ;;  %v3603_v1 = vpop.f32.mrb[56].mxu1 }
 0x423   : > { %v2405_v37 = vpop.f32.mrb[57].mxu1 }
 0x424   : > { %v2353_v23 = vmax.f32 %v2351_v22, %v2352_v39  ;;  %v3604_v41 = vpop.f32.mrb[58].mxu1 }
 0x425   : > { %v2469_v61 = vpack.c.bf16 %v3604_v41, %v3603_v1  ;;  %v2408_v7 = vpop.f32.mrb[59].mxu1 }
 0x426   : > { %v2354_v9 = vsub.f32 %v2340_v21, %v2353_v23  ;;  %v2355_v53 = vsub.f32 %v2343_v52, %v2353_v23  ;;  %v2468_v10 = vpack.c.bf16 %v2408_v7, %v2405_v37 }
 0x428   : > { %v2356_v48 = vmul.f32 1.442695, %v2354_v9  ;;  %v2358_v24 = vmul.f32 1.442695, %v2355_v53  ;;  %3651 = vmatprep.mubr.msk.bf16.mxu0 %vm1749_vm1, %v2468_v10 }
 0x42a   : > { %3897 = vpow2.f32 %v2356_v48  ;;  %v3607_v46 = vpop.f32.mrb[60].mxu1 }
 0x42b   : > { %3899 = vpow2.f32 %v2358_v24  ;;  %v2421_v13 = vpop.f32.mrb[61].mxu1 }
 0x42c   : > { %v3608_v51 = vpop.f32.mrb[62].mxu1 }
 0x42d   : > { %v2471_v6 = vpack.c.bf16 %v3608_v51, %v3607_v46  ;;  %v2424_v50 = vpop.f32.mrb[63].mxu1 }
 0x42e   : > { %v2470_v49 = vpack.c.bf16 %v2424_v50, %v2421_v13 }
 0x432   : > { %v3611_v32 = vpop.f32.mrb[64].mxu1 }
 0x433   : > { %v2437_v58 = vpop.f32.mrb[65].mxu1 }
 0x434   : > { %v3898_v56 = vpop.eup %3897  ;;  %v3612_v26 = vpop.f32.mrb[66].mxu1 }
 0x435   : > { %v3900_v55 = vpop.eup %3899  ;;  %v2473_v63 = vpack.c.bf16 %v3612_v26, %v3611_v32  ;;  %v2440_v38 = vpop.f32.mrb[67].mxu1 }
 0x436   : > { %v2360_v0 = vadd.f32 %v3900_v55, %v3898_v56  ;;  %v2472_v2 = vpack.c.bf16 %v2440_v38, %v2437_v58 }
 0x438   : > { %v2361_v3 = vrot.slane %v2360_v0, 4 }
 0x43a   : > { %v2362_v18 = vadd.f32 %v2361_v3, %v2360_v0  ;;  %v3615_v4 = vpop.f32.mrb[68].mxu1 }
 0x43b   : > { %v2453_v42 = vpop.f32.mrb[69].mxu1 }
 0x43c   : > { %v2363_v14 = vrot.slane %v2362_v18, 2  ;;  %v3616_v15 = vpop.f32.mrb[70].mxu1 }
 0x43d   : > { %v2475_v16 = vpack.c.bf16 %v3616_v15, %v3615_v4  ;;  %v2456_v19 = vpop.f32.mrb[71].mxu1 }
 0x43e   : > { %v2364_v59 = vadd.f32 %v2363_v14, %v2362_v18  ;;  %v2474_v60 = vpack.c.bf16 %v2456_v19, %v2453_v42 }
 0x440   : > { %v2365_v20 = vrot.slane %v2364_v59, 1 }
 0x442   : > { %v2366_v5 = vadd.f32 %v2365_v20, %v2364_v59 }
 0x444   : > { %3901 = vrcp.f32 %v2366_v5 }
 0x44e   : > { %v3902_v21 = vpop.eup %3901 }
 0x44f   : > { %v2368_v12 = vmul.f32 %v3902_v21, %v3898_v56  ;;  %v2369_v52 = vmul.f32 %v3902_v21, %v3900_v55 }
 0x451   : > { %v2476_v36 = vpack.c.bf16 %v2369_v52, %v2368_v12 }
 0x453   : > { %3649 = vmatprep.subr.bf16.mxu0 %v2476_v36 }
 0x454   : > { %3650 = vmatpush3.bf16.msra.mxu0 %v2476_v36 }
 0x457   : > { %3652 = vmatmul.mubr.msk.bf16.vlgmr.msra.gmra.mrb[56].mxu0 %vm1749_vm1, %v2469_v61 }
 0x458   : > { %3655 = vmatprep.mubr.msk.bf16.mxu0 %vm1749_vm1, %v2470_v49 }
 0x45f   : > { %3656 = vmatmul.mubr.msk.bf16.gmra.mrb[60].mxu0 %vm1749_vm1, %v2471_v6 }
 0x460   : > { %3659 = vmatprep.mubr.msk.bf16.mxu0 %vm1749_vm1, %v2472_v2 }
 0x467   : > { %3660 = vmatmul.mubr.msk.bf16.gmra.mrb[64].mxu0 %vm1749_vm1, %v2473_v63 }
 0x468   : > { %3663 = vmatprep.mubr.msk.bf16.mxu0 %vm1749_vm1, %v2474_v60 }
 0x46f   : > { %3664 = vmatmul.mubr.msk.bf16.gmra.mrb[68].mxu0 %vm1749_vm1, %v2475_v16 }
 0x52a   : > { %v3653_v34 = vpop.f32.mrb[56].mxu0 }
 0x52b   : > { %v2705_v44 = vadd.f32 %v3653_v34, %v4924_v33  ;;  %v2640_v45 = vpop.f32.mrb[57].mxu0 }
 0x52c   : > { %v2703_v54 = vadd.f32 %v2640_v45, %v4920_v28  ;;  %v3654_v22 = vpop.f32.mrb[58].mxu0 }
 0x52d   : > { %v2706_v39 = vadd.f32 %v3654_v22, %v4926_v35  ;;  %v2643_v1 = vpop.f32.mrb[59].mxu0  ;;  %v2721_v23 = vmax.f32 %v2705_v44, 0.0 }
 0x52e   : > { %v2704_v37 = vadd.f32 %v2643_v1, %v4922_v31  ;;  %v2719_v61 = vmax.f32 %v2703_v54, 0.0 }
 0x52f   : > { %v2722_v41 = vmax.f32 %v2706_v39, 0.0 }
 0x530   : > { %v2720_v7 = vmax.f32 %v2704_v37, 0.0 }
 0x531   : > { %v3214_v9 = vpack.c.bf16 %v2722_v41, %v2721_v23 }
 0x532   : > { %v3209_v53 = vpack.c.bf16 %v2720_v7, %v2719_v61  ;;  %v3657_v10 = vpop.f32.mrb[60].mxu0 }
 0x533   : > { %3254 = vst [vmem:[%s4945_s15 + $0x48] sm:$0xff] %v3214_v9   ;;  %v2709_v33 = vadd.f32 %v3657_v10, %v4932_v40  ;;  %v2656_v48 = vpop.f32.mrb[61].mxu0 }
 0x534   : > { %3253 = vst [vmem:[%s4945_s15 + $0x40] sm:$0xff] %v3209_v53   ;;  %v2707_v28 = vadd.f32 %v2656_v48, %v4928_v30  ;;  %v3658_v35 = vpop.f32.mrb[62].mxu0 }
 0x535   : > { %v2710_v24 = vadd.f32 %v3658_v35, %v4935_v17  ;;  %v2659_v31 = vpop.f32.mrb[63].mxu0  ;;  %v2725_v13 = vmax.f32 %v2709_v33, 0.0 }
 0x536   : > { %v2708_v46 = vadd.f32 %v2659_v31, %v4930_v47  ;;  %v2723_v6 = vmax.f32 %v2707_v28, 0.0 }
 0x537   : > { %v2726_v51 = vmax.f32 %v2710_v24, 0.0 }
 0x538   : > { %v2724_v50 = vmax.f32 %v2708_v46, 0.0 }
 0x539   : > { %v3224_v49 = vpack.c.bf16 %v2726_v51, %v2725_v13 }
 0x53a   : > { %v3219_v32 = vpack.c.bf16 %v2724_v50, %v2723_v6  ;;  %v3661_v58 = vpop.f32.mrb[64].mxu0 }
 0x53b   : > { %3256 = vst [vmem:[%s4945_s15 + $0x58] sm:$0xff] %v3224_v49   ;;  %v2713_v40 = vadd.f32 %v3661_v58, %v4952_v29  ;;  %v2672_v56 = vpop.f32.mrb[65].mxu0 }
 0x53c   : > { %3255 = vst [vmem:[%s4945_s15 + $0x50] sm:$0xff] %v3219_v32   ;;  %v2711_v30 = vadd.f32 %v2672_v56, %v4940_v8  ;;  %v3662_v17 = vpop.f32.mrb[66].mxu0 }
 0x53d   : > { %v2714_v26 = vadd.f32 %v3662_v17, %v4955_v57  ;;  %v2675_v47 = vpop.f32.mrb[67].mxu0  ;;  %v2729_v63 = vmax.f32 %v2713_v40, 0.0 }
 0x53e   : > { %v2712_v55 = vadd.f32 %v2675_v47, %v4942_v62  ;;  %v2727_v0 = vmax.f32 %v2711_v30, 0.0 }
 0x53f   : > { %v2730_v38 = vmax.f32 %v2714_v26, 0.0 }
 0x540   : > { %v2728_v2 = vmax.f32 %v2712_v55, 0.0 }
 0x541   : > { %v3234_v3 = vpack.c.bf16 %v2730_v38, %v2729_v63 }
 0x542   : > { %v3229_v18 = vpack.c.bf16 %v2728_v2, %v2727_v0  ;;  %v3665_v29 = vpop.f32.mrb[68].mxu0 }
 0x543   : > { %3258 = vst [vmem:[%s4945_s15 + $0x68] sm:$0xff] %v3234_v3   ;;  %v2717_v4 = vadd.f32 %v3665_v29, %v4967_v27  ;;  %v2688_v42 = vpop.f32.mrb[69].mxu0 }
 0x544   : > { %3257 = vst [vmem:[%s4945_s15 + $0x60] sm:$0xff] %v3229_v18   ;;  %v2715_v8 = vadd.f32 %v2688_v42, %v4959_v11  ;;  %v3666_v57 = vpop.f32.mrb[70].mxu0 }
 0x545   : > { %v2718_v62 = vadd.f32 %v3666_v57, %v4971_v25  ;;  %v2691_v14 = vpop.f32.mrb[71].mxu0  ;;  %v2733_v16 = vmax.f32 %v2717_v4, 0.0 }
 0x546   : > { %v2716_v15 = vadd.f32 %v2691_v14, %v4964_v43  ;;  %v2731_v59 = vmax.f32 %v2715_v8, 0.0 }
 0x547   : > { %v2734_v19 = vmax.f32 %v2718_v62, 0.0 }
 0x548   : > { %v2732_v27 = vmax.f32 %v2716_v15, 0.0 }
 0x549   : > { %v3244_v11 = vpack.c.bf16 %v2734_v19, %v2733_v16 }
 0x54a   : > { %v3239_v25 = vpack.c.bf16 %v2732_v27, %v2731_v59 }
 0x54b   : > { %3260 = vst [vmem:[%s4945_s15 + $0x78] sm:$0xff] %v3244_v11  }
 0x54c   : > { %3259 = vst [vmem:[%s4945_s15 + $0x70] sm:$0xff] %v3239_v25  }
 0x54d   : > { %4056 = shalt.err (!%p4053_p9)
}
 0x54e   : > { %s4057_s22 = scalar_lea.hbm %s5014_s28, 2048  ;;  %s4061_s18 = scalar_lea.hbm %s5115_s21, 4096 }
 0x54f   : > { %p4058_p10 = scmp.ne.s32.totalorder %s5014_s28, %s4057_s22  ;;  %p4062_p1 = scmp.lt.u32.totalorder %s5014_s28, %s5115_s21 }
 0x550   : > { %p4063_p5 = scmp.lt.u32.totalorder %s4061_s18, %s4057_s22  ;;  %p4065_p13 = scmp.lt.u32.totalorder %s4057_s22, %s5014_s28 }
 0x551   : > { %p4059_p0 = pnand %p4058_p10, %p5116_p12 }
 0x552   : > { %p4064_p11 = por %p4063_p5, %p4062_p1 }
 0x553   : > { %p4060_p3 = pneg %p4059_p0 }
 0x554   : > { %p4066_p2 = por %p4065_p13, %p4064_p11 }
 0x556   : > { %p4067_p6 = pnand %p4066_p2, %p4060_p3 }
 0x558   : > { %4070 = shalt.err (!%p4067_p6)
}
 0x559   : > { %s4148_s20 = smov 64   ;;  %s4149_s25 = smov 128  }
 0x55a   : > { %s4150_s30 = smov 4  }
 0x55b   : > { %3719 = dma.vmem_to_hbm [thread:$0]  (%p5116_p12), %s5016_s29, 2048, %s5014_s28, %s5022_s17, %s4148_s20, %s4149_s25, %s4150_s30  }
 0x55c PF: > { %s5117_s9 = sld [smem:[#allocation17_spill]]  ;;  %s5118_s16 = sld [smem:[#allocation22_spill]] }
 0x562   : > { %s2847_s23 = sand.u32 1, %s5117_s9   ;;  %p5119_p7 = scmp.ne.s32.totalorder %s5118_s16, 0 }
 0x563   : > { %s2848_s2 = scalar_lea.sflag [#allocation5], %s2847_s23 }
 0x564   : > { %p3738_p8 = pnand %p2972_p4, %p5119_p7 }
 0x566   : > { %4108 = dma.done.wait (!%p3738_p8), %s2848_s2, 2048  }
 0x567   : > { %4110 = vsyncadd (!%p3738_p8), %s2848_s2, 4294965248  ;;  %s25_s14 = sadd.s32 1, %s4133_s14   ;;  %s5120_s26 = sld [smem:[#allocation21_spill]] }
 0x568   : > { %p22_p9 = scmp.ge.s32.totalorder %s25_s14, 4   ;;  %s5121_s27 = sld [smem:[#allocation19_spill]] }
 0x569   : > { %s5122_s30 = smov %s4117_s10  ;;  %s5123_s10 = smov %s4121_s11 }
 0x56a   : > { %s5125_s12 = smov %s4129_s13  ;;  %24 = sbr.rel (!%p22_p9) target bundleno = 11 (0xb), region = 162 }
 0x56d   : > { %s5124_s11 = smov %s5120_s26 }
 0x56e   : > { %s5126_s13 = smov %s5121_s27 }
 0x571   :  { %2853 = vsyncpa [#allocation4], 1 }
 0x572   :  { %2855 = vsyncpa [#allocation4 + $0x1], 1 }
 0x573   :  { %2856 = vsyncpa [#allocation7], 1 }
 0x574   :  { %2857 = vsyncpa [#allocation10], 1 }
 0x575   :  { %2858 = vsyncpa [#allocation5], 1 }
 0x576   :  { %2860 = vsyncpa [#allocation5 + $0x1], 1 }

</bundles_post_ra>
